<compile_context>
chip_gen: v7x
topology: tpu7x:2x2x1
jax: 0.10.0
libtpu: 0.0.40
codegen_flags: <defaults>
</compile_context>

<pallas_src>
import math
import numpy as np
import jax
import jax.numpy as jnp
from jax import lax
from jax.experimental import pallas as pl
from jax.experimental.pallas import tpu as pltpu


# ----------------------------- rotary helpers (host-side, one-time) ----------
def get_rotary_matrix(context_window, embedding_dim):
    # Exact reproduction of the PyTorch helper (including the (i - 1) term).
    # Used only by the pure-JAX reference.
    R = np.zeros((context_window, embedding_dim, embedding_dim), dtype=np.float32)
    for position in range(context_window):
        for i in range(embedding_dim // 2):
            theta = 10000.0 ** (-2.0 * (i - 1) / embedding_dim)
            m_theta = position * theta
            R[position, 2 * i, 2 * i] = np.cos(m_theta)
            R[position, 2 * i, 2 * i + 1] = -np.sin(m_theta)
            R[position, 2 * i + 1, 2 * i] = np.sin(m_theta)
            R[position, 2 * i + 1, 2 * i + 1] = np.cos(m_theta)
    return jnp.asarray(R)


def get_rope_tables(context_window, embedding_dim):
    """cos / signed-sin tables equivalent to  out = q @ R[p]  of the matrix form:
       out[2i]   =  q[2i]*cos + q[2i+1]*sin
       out[2i+1] = -q[2i]*sin + q[2i+1]*cos
    cos[p, 2i] = cos[p, 2i+1] = cos(p*theta_i);  sin[p, 2i] = +sin, sin[p, 2i+1] = -sin."""
    half = embedding_dim // 2
    i = np.arange(half, dtype=np.float64)
    theta = 10000.0 ** (-2.0 * (i - 1.0) / embedding_dim)       # keeps the (i-1) quirk
    pos = np.arange(context_window, dtype=np.float64)[:, None]
    ang = pos * theta[None, :]                                   # (CW, half)
    cos = np.cos(ang)
    sin = np.sin(ang)
    cos_t = np.repeat(cos, 2, axis=1)                            # [c0,c0,c1,c1,...]
    sin_t = np.stack([sin, -sin], axis=-1).reshape(context_window, embedding_dim)
    return jnp.asarray(cos_t, jnp.float32), jnp.asarray(sin_t, jnp.float32)


# ----------------------------- one-time parameter fusion ---------------------
def prepare_params(Wq, Wk, Wv, Wo, bo, context_window):
    """Fuse per-head weights into lane-dense slabs (done once, not per call)."""
    H, D, _ = Wq.shape
    HD = H * D
    P = ((D + 127) // 128) * 128                                  # lane-dense output width

    def stack_heads_T(W):        # (H, Dout, Din) -> (Din, H*Dout), block h = W[h].T
        return jnp.transpose(W, (2, 0, 1)).reshape(D, HD)

    def swap_pair_cols(Wt):      # swap adjacent output columns (folds RoPE pair-swap)
        return Wt.reshape(D, HD // 2, 2)[:, :, ::-1].reshape(D, HD)

    WqT = stack_heads_T(Wq)
    WkT = stack_heads_T(Wk)
    WvT = stack_heads_T(Wv)
    W_qkv = jnp.concatenate(
        [WqT, swap_pair_cols(WqT), WkT, swap_pair_cols(WkT), WvT], axis=1)  # (D, 5*HD)
    W_qkv = W_qkv.astype(jnp.bfloat16)                            # pre-cast for the MXU

    cos_t, sin_t = get_rope_tables(context_window, D)             # (CW, D)
    cos_t = jnp.tile(cos_t, (1, H))                               # (CW, HD) per-head tiled
    sin_t = jnp.tile(sin_t, (1, H))
    cs = jnp.concatenate([cos_t, sin_t], axis=1)                  # (CW, 2*HD), f32

    Wo_pad = jnp.zeros((HD, P), jnp.float32).at[:, :D].set(Wo.T)  # lane-dense projection
    Wo_pad = Wo_pad.astype(jnp.bfloat16)
    bo_pad = jnp.zeros((1, P), jnp.float32).at[:, :D].set(bo.reshape(1, D))
    return W_qkv, cs, Wo_pad, bo_pad


# ----------------------------- fused attention + projection kernel -----------
def fused_mha_kernel(x_ref, w_qkv_ref, cs_ref, wo_ref, bo_ref, o_ref):
    # x_ref:    (B*M, D)    f32   batch folded into rows
    # w_qkv_ref:(D, 5*H*D)  bf16  [Q | Qswap | K | Kswap | V] fused weight slab
    # cs_ref:   (M, 2*H*D)  f32   packed [cos | sin] rotary tables (per-head tiled)
    # wo_ref:   (H*D, P)    bf16  output projection, zero-padded to P=128 lanes
    # bo_ref:   (1, P)      f32   output projection bias (padded)
    # o_ref:    (B*M, P)    f32   lane-dense output slab
    BM, D = x_ref.shape
    M = cs_ref.shape[0]
    HD = cs_ref.shape[1] // 2
    H = HD // D
    B = BM // M
    P = o_ref.shape[1]

    # One lane-dense bf16 matmul produces Q, pair-swapped Q, K, pair-swapped K, V
    # for all heads and all batch rows: (B*M, D) @ (D, 5*HD), f32 accumulation.
    qkv = jnp.dot(x_ref[...].astype(jnp.bfloat16), w_qkv_ref[...],
                  preferred_element_type=jnp.float32)              # (B*M, 5*HD) f32

    cos = cs_ref[:, :HD]                                           # vreg-aligned split
    sin = cs_ref[:, HD:]

    scale = 1.0 / math.sqrt(D)
    row = lax.broadcasted_iota(jnp.int32, (M, M), 0)
    col = lax.broadcasted_iota(jnp.int32, (M, M), 1)
    causal = col <= row
    neg = jnp.float32(-1e30)                                       # finite mask (NaN-safe)

    for b in range(B):                                             # B=2, unrolled
        r0 = b * M
        q = qkv[r0:r0 + M, 0 * HD:1 * HD]
        q_s = qkv[r0:r0 + M, 1 * HD:2 * HD]
        k = qkv[r0:r0 + M, 2 * HD:3 * HD]
        k_s = qkv[r0:r0 + M, 3 * HD:4 * HD]
        v = qkv[r0:r0 + M, 4 * HD:5 * HD]

        # Elementwise RoPE in f32 (VPU only; pair-swap already folded into weights).
        q_rot = (q * cos + q_s * sin).astype(jnp.bfloat16)
        k_rot = (k * cos + k_s * sin).astype(jnp.bfloat16)
        v_bf = v.astype(jnp.bfloat16)

        out_b = None
        for h in range(H):                                         # H=4, unrolled
            sl = slice(h * D, (h + 1) * D)
            qh = q_rot[:, sl]                                      # (M, D)
            kh = k_rot[:, sl]
            vh = v_bf[:, sl]
            # q @ k^T without materializing a transpose (bf16 operands, f32 acc).
            s = lax.dot_general(qh, kh, (((1,), (1,)), ((), ())),
                                preferred_element_type=jnp.float32) * scale    # (M, M)
            s = jnp.where(causal, s, neg)
            s = s - jnp.max(s, axis=-1, keepdims=True)
            p = jnp.exp(s)                                         # f32 EUP
            l = jnp.sum(p, axis=-1, keepdims=True)
            acc = jnp.dot(p.astype(jnp.bfloat16), vh,
                          preferred_element_type=jnp.float32)       # (M, D)
            head = (acc * pl.reciprocal(l, approx=True)).astype(jnp.bfloat16)
            # Tile-aligned per-head projection accumulate (no lane-offset concat):
            contrib = jnp.dot(head, wo_ref[sl, :],
                              preferred_element_type=jnp.float32)   # (M, P)
            out_b = contrib if out_b is None else out_b + contrib

        # Unmasked lane-dense store: (M, P=128) at a sublane-aligned row offset.
        o_ref[r0:r0 + M, :] = out_b + bo_ref[...]


# ----------------------------- wrapper ---------------------------------------
def rope_masked_multihead_attention(x, params):
    """x: (B, M, D); params from prepare_params."""
    W_qkv, cs_full, Wo_pad, bo_pad = params
    B, M, D = x.shape
    HD, P = Wo_pad.shape
    H = HD // D
    cs = cs_full[:M]
    x2 = x.reshape(B * M, D)

    cost = pl.CostEstimate(
        flops=(2 * B * M * D * 5 * HD            # fused QKV matmul
               + 2 * B * H * 2 * M * M * D       # per-head QK^T and PV
               + 2 * B * M * HD * P),            # output projection
        transcendentals=B * H * M * (M + 1),     # exp + reciprocal
        bytes_accessed=(x2.size * 4 + W_qkv.size * 2 + cs.size * 4
                        + Wo_pad.size * 2 + bo_pad.size * 4 + B * M * P * 4),
    )

    out = pl.pallas_call(
        fused_mha_kernel,
        out_shape=jax.ShapeDtypeStruct((B * M, P), jnp.float32),
        grid=(1,),                                                 # single invocation
        in_specs=[
            pl.BlockSpec((B * M, D), lambda i: (0, 0)),            # x (batch folded)
            pl.BlockSpec((D, W_qkv.shape[1]), lambda i: (0, 0)),   # fused QKV weights
            pl.BlockSpec((M, 2 * HD), lambda i: (0, 0)),           # packed cos|sin
            pl.BlockSpec((HD, P), lambda i: (0, 0)),               # Wo^T (padded)
            pl.BlockSpec((1, P), lambda i: (0, 0)),                # bias (padded)
        ],
        out_specs=pl.BlockSpec((B * M, P), lambda i: (0, 0)),
        compiler_params=pltpu.CompilerParams(
            dimension_semantics=("arbitrary",)),
        cost_estimate=cost,
    )(x2, W_qkv, cs, Wo_pad, bo_pad)

    return out[:, :D].reshape(B, M, D)


# ----------------------------- pure-JAX reference (matrix-form RoPE) ---------
def reference_forward(x, Wq, Wk, Wv, R_full, Wo, bo):
    B, M, D = x.shape
    H = Wq.shape[0]
    R = R_full[:M]
    outs = []
    for h in range(H):
        q = x @ Wq[h].T
        k = x @ Wk[h].T
        v = x @ Wv[h].T
        q_rot = jnp.einsum("bmd,mde->bme", q, R)
        k_rot = jnp.einsum("bmd,mde->bme", k, R)
        scores = jnp.einsum("bqd,bkd->bqk", q_rot, k_rot) / math.sqrt(D)
        mask = jnp.tril(jnp.ones((M, M), dtype=bool))
        scores = jnp.where(mask[None], scores, -jnp.inf)
        p = jax.nn.softmax(scores, axis=-1)
        outs.append(jnp.einsum("bqk,bkd->bqd", p, v))
    cat = jnp.concatenate(outs, axis=-1)
    return cat @ Wo.T + bo


# ----------------------------- main -------------------------------------------
if __name__ == "__main__":
    config = {"d_model": 32, "context_window": 16, "n_heads": 4}
    B, M, D, H = 2, 8, config["d_model"], config["n_heads"]

    key = jax.random.PRNGKey(0)
    kx, kq, kk, kv, ko, kb = jax.random.split(key, 6)

    # Deterministic parameter init (PyTorch nn.Linear default range).
    lim = 1.0 / math.sqrt(D)
    Wq = jax.random.uniform(kq, (H, D, D), jnp.float32, -lim, lim)
    Wk = jax.random.uniform(kk, (H, D, D), jnp.float32, -lim, lim)
    Wv = jax.random.uniform(kv, (H, D, D), jnp.float32, -lim, lim)
    lim_o = 1.0 / math.sqrt(H * D)
    Wo = jax.random.uniform(ko, (D, H * D), jnp.float32, -lim_o, lim_o)
    bo = jax.random.uniform(kb, (D,), jnp.float32, -lim_o, lim_o)

    x = jax.random.normal(kx, (B, M, D), jnp.float32)

    # One-time parameter fusion (no per-call transposes / casts).
    params = prepare_params(Wq, Wk, Wv, Wo, bo, config["context_window"])

    out = rope_masked_multihead_attention(x, params)
    out = jax.block_until_ready(out)

    # Reference uses the original (M, D, D) rotation-matrix formulation, so this
    # also validates the cos/sin rewrite. Tolerance accounts for bf16 MXU
    # operands (f32 accumulation) and the EUP approximate reciprocal.
    R_full = get_rotary_matrix(config["context_window"], D)
    ref = reference_forward(x, Wq, Wk, Wv, R_full, Wo, bo)
    ref = jax.block_until_ready(ref)

    assert out.shape == (B, M, D), out.shape
    np.testing.assert_allclose(np.asarray(out), np.asarray(ref), rtol=2e-2, atol=2e-2)
    print("KERNEL_OK")
</pallas_src>

<mosaic_0001>
module attributes {stable_mosaic.version = 11 : i64} {
  func.func @fused_mha_kernel(%arg0: i32, %arg1: memref<16x32xf32, #tpu.memory_space<vmem>>, %arg2: memref<32x640xbf16, #tpu.memory_space<vmem>>, %arg3: memref<8x256xf32, #tpu.memory_space<vmem>>, %arg4: memref<128x128xbf16, #tpu.memory_space<vmem>>, %arg5: memref<1x128xf32, #tpu.memory_space<vmem>>, %arg6: memref<16x128xf32, #tpu.memory_space<vmem>>) attributes {dimension_semantics = [#tpu.dimension_semantics<arbitrary>], iteration_bounds = array<i64: 1>, scalar_prefetch = 0 : i64, scratch_operands = 0 : i64, tpu.core_type = #tpu.core_type<tc>, window_params = [{pipeline_mode = #tpu.pipeline_mode<synchronous>, transform_indices = @transform_0, window_bounds = array<i64: 16, 32>}, {pipeline_mode = #tpu.pipeline_mode<synchronous>, transform_indices = @transform_1, window_bounds = array<i64: 32, 640>}, {pipeline_mode = #tpu.pipeline_mode<synchronous>, transform_indices = @transform_2, window_bounds = array<i64: 8, 256>}, {pipeline_mode = #tpu.pipeline_mode<synchronous>, transform_indices = @transform_3, window_bounds = array<i64: 128, 128>}, {pipeline_mode = #tpu.pipeline_mode<synchronous>, transform_indices = @transform_4, window_bounds = array<i64: 1, 128>}, {pipeline_mode = #tpu.pipeline_mode<synchronous>, transform_indices = @transform_5, window_bounds = array<i64: 16, 128>}]} {
    %c0 = arith.constant 0 : index
    %c0_0 = arith.constant 0 : index
    %0 = vector.load %arg1[%c0, %c0_0] : memref<16x32xf32, #tpu.memory_space<vmem>>, vector<16x32xf32>
    %1 = arith.truncf %0 : vector<16x32xf32> to vector<16x32xbf16>
    %c0_1 = arith.constant 0 : index
    %c0_2 = arith.constant 0 : index
    %2 = vector.load %arg2[%c0_1, %c0_2] : memref<32x640xbf16, #tpu.memory_space<vmem>>, vector<32x640xbf16>
    %cst = arith.constant dense<0.000000e+00> : vector<16x640xf32>
    %3 = tpu.matmul %1, %2, %cst {dimension_numbers = #tpu.dot_dimension_numbers<[1], [0], [0], [1], [0, 0, 1, 1], [], []>} : vector<16x32xbf16>, vector<32x640xbf16>, vector<16x640xf32> -> vector<16x640xf32>
    %c0_3 = arith.constant 0 : index
    %c0_4 = arith.constant 0 : index
    %4 = vector.load %arg3[%c0_3, %c0_4] : memref<8x256xf32, #tpu.memory_space<vmem>>, vector<8x128xf32>
    %c0_5 = arith.constant 0 : index
    %c128 = arith.constant 128 : index
    %5 = vector.load %arg3[%c0_5, %c128] : memref<8x256xf32, #tpu.memory_space<vmem>>, vector<8x128xf32>
    %6 = tpu.iota {dimensions = array<i32: 0>} : vector<8x8xi32>
    %7 = tpu.iota {dimensions = array<i32: 1>} : vector<8x8xi32>
    %8 = arith.cmpi sle, %7, %6 : vector<8x8xi32>
    %9 = vector.extract_strided_slice %3 {offsets = [0, 0], sizes = [8, 128], strides = [1, 1]} : vector<16x640xf32> to vector<8x128xf32>
    %10 = vector.extract_strided_slice %3 {offsets = [0, 128], sizes = [8, 128], strides = [1, 1]} : vector<16x640xf32> to vector<8x128xf32>
    %11 = vector.extract_strided_slice %3 {offsets = [0, 256], sizes = [8, 128], strides = [1, 1]} : vector<16x640xf32> to vector<8x128xf32>
    %12 = vector.extract_strided_slice %3 {offsets = [0, 384], sizes = [8, 128], strides = [1, 1]} : vector<16x640xf32> to vector<8x128xf32>
    %13 = vector.extract_strided_slice %3 {offsets = [0, 512], sizes = [8, 128], strides = [1, 1]} : vector<16x640xf32> to vector<8x128xf32>
    %14 = arith.mulf %9, %4 : vector<8x128xf32>
    %15 = arith.mulf %10, %5 : vector<8x128xf32>
    %16 = arith.addf %14, %15 : vector<8x128xf32>
    %17 = arith.truncf %16 : vector<8x128xf32> to vector<8x128xbf16>
    %18 = arith.mulf %11, %4 : vector<8x128xf32>
    %19 = arith.mulf %12, %5 : vector<8x128xf32>
    %20 = arith.addf %18, %19 : vector<8x128xf32>
    %21 = arith.truncf %20 : vector<8x128xf32> to vector<8x128xbf16>
    %22 = arith.truncf %13 : vector<8x128xf32> to vector<8x128xbf16>
    %23 = vector.extract_strided_slice %17 {offsets = [0, 0], sizes = [8, 32], strides = [1, 1]} : vector<8x128xbf16> to vector<8x32xbf16>
    %24 = vector.extract_strided_slice %21 {offsets = [0, 0], sizes = [8, 32], strides = [1, 1]} : vector<8x128xbf16> to vector<8x32xbf16>
    %25 = vector.extract_strided_slice %22 {offsets = [0, 0], sizes = [8, 32], strides = [1, 1]} : vector<8x128xbf16> to vector<8x32xbf16>
    %cst_6 = arith.constant dense<0.000000e+00> : vector<8x8xf32>
    %26 = tpu.matmul %23, %24, %cst_6 {dimension_numbers = #tpu.dot_dimension_numbers<[1], [1], [0], [0], [0, 0, 1, 0], [], []>} : vector<8x32xbf16>, vector<8x32xbf16>, vector<8x8xf32> -> vector<8x8xf32>
    %cst_7 = arith.constant 0.176776692 : f32
    %27 = vector.broadcast %cst_7 : f32 to vector<8x8xf32>
    %28 = arith.mulf %26, %27 : vector<8x8xf32>
    %cst_8 = arith.constant -1.000000e+30 : f32
    %29 = vector.broadcast %cst_8 : f32 to vector<8x8xf32>
    %30 = arith.select %8, %28, %29 : vector<8x8xi1>, vector<8x8xf32>
    %cst_9 = arith.constant dense<0xFF800000> : vector<8xf32>
    %31 = vector.multi_reduction <maximumf>, %30, %cst_9 [1] : vector<8x8xf32> to vector<8xf32>
    %32 = vector.shape_cast %31 : vector<8xf32> to vector<8x1xf32>
    %33 = vector.broadcast %32 : vector<8x1xf32> to vector<8x8xf32>
    %34 = arith.subf %30, %33 : vector<8x8xf32>
    %35 = math.exp %34 : vector<8x8xf32>
    %cst_10 = arith.constant dense<0.000000e+00> : vector<8xf32>
    %36 = vector.multi_reduction <add>, %35, %cst_10 [1] : vector<8x8xf32> to vector<8xf32>
    %37 = vector.shape_cast %36 : vector<8xf32> to vector<8x1xf32>
    %38 = arith.truncf %35 : vector<8x8xf32> to vector<8x8xbf16>
    %cst_11 = arith.constant dense<0.000000e+00> : vector<8x32xf32>
    %39 = tpu.matmul %38, %25, %cst_11 {dimension_numbers = #tpu.dot_dimension_numbers<[1], [0], [0], [1], [0, 0, 1, 1], [], []>} : vector<8x8xbf16>, vector<8x32xbf16>, vector<8x32xf32> -> vector<8x32xf32>
    %40 = tpu.reciprocal %37 {approx = true} : vector<8x1xf32> -> vector<8x1xf32>
    %41 = vector.broadcast %40 : vector<8x1xf32> to vector<8x32xf32>
    %42 = arith.mulf %39, %41 : vector<8x32xf32>
    %43 = arith.truncf %42 : vector<8x32xf32> to vector<8x32xbf16>
    %c0_12 = arith.constant 0 : index
    %c0_13 = arith.constant 0 : index
    %44 = vector.load %arg4[%c0_12, %c0_13] : memref<128x128xbf16, #tpu.memory_space<vmem>>, vector<32x128xbf16>
    %cst_14 = arith.constant dense<0.000000e+00> : vector<8x128xf32>
    %45 = tpu.matmul %43, %44, %cst_14 {dimension_numbers = #tpu.dot_dimension_numbers<[1], [0], [0], [1], [0, 0, 1, 1], [], []>} : vector<8x32xbf16>, vector<32x128xbf16>, vector<8x128xf32> -> vector<8x128xf32>
    %46 = vector.extract_strided_slice %17 {offsets = [0, 32], sizes = [8, 32], strides = [1, 1]} : vector<8x128xbf16> to vector<8x32xbf16>
    %47 = vector.extract_strided_slice %21 {offsets = [0, 32], sizes = [8, 32], strides = [1, 1]} : vector<8x128xbf16> to vector<8x32xbf16>
    %48 = vector.extract_strided_slice %22 {offsets = [0, 32], sizes = [8, 32], strides = [1, 1]} : vector<8x128xbf16> to vector<8x32xbf16>
    %cst_15 = arith.constant dense<0.000000e+00> : vector<8x8xf32>
    %49 = tpu.matmul %46, %47, %cst_15 {dimension_numbers = #tpu.dot_dimension_numbers<[1], [1], [0], [0], [0, 0, 1, 0], [], []>} : vector<8x32xbf16>, vector<8x32xbf16>, vector<8x8xf32> -> vector<8x8xf32>
    %cst_16 = arith.constant 0.176776692 : f32
    %50 = vector.broadcast %cst_16 : f32 to vector<8x8xf32>
    %51 = arith.mulf %49, %50 : vector<8x8xf32>
    %cst_17 = arith.constant -1.000000e+30 : f32
    %52 = vector.broadcast %cst_17 : f32 to vector<8x8xf32>
    %53 = arith.select %8, %51, %52 : vector<8x8xi1>, vector<8x8xf32>
    %cst_18 = arith.constant dense<0xFF800000> : vector<8xf32>
    %54 = vector.multi_reduction <maximumf>, %53, %cst_18 [1] : vector<8x8xf32> to vector<8xf32>
    %55 = vector.shape_cast %54 : vector<8xf32> to vector<8x1xf32>
    %56 = vector.broadcast %55 : vector<8x1xf32> to vector<8x8xf32>
    %57 = arith.subf %53, %56 : vector<8x8xf32>
    %58 = math.exp %57 : vector<8x8xf32>
    %cst_19 = arith.constant dense<0.000000e+00> : vector<8xf32>
    %59 = vector.multi_reduction <add>, %58, %cst_19 [1] : vector<8x8xf32> to vector<8xf32>
    %60 = vector.shape_cast %59 : vector<8xf32> to vector<8x1xf32>
    %61 = arith.truncf %58 : vector<8x8xf32> to vector<8x8xbf16>
    %cst_20 = arith.constant dense<0.000000e+00> : vector<8x32xf32>
    %62 = tpu.matmul %61, %48, %cst_20 {dimension_numbers = #tpu.dot_dimension_numbers<[1], [0], [0], [1], [0, 0, 1, 1], [], []>} : vector<8x8xbf16>, vector<8x32xbf16>, vector<8x32xf32> -> vector<8x32xf32>
    %63 = tpu.reciprocal %60 {approx = true} : vector<8x1xf32> -> vector<8x1xf32>
    %64 = vector.broadcast %63 : vector<8x1xf32> to vector<8x32xf32>
    %65 = arith.mulf %62, %64 : vector<8x32xf32>
    %66 = arith.truncf %65 : vector<8x32xf32> to vector<8x32xbf16>
    %c32 = arith.constant 32 : index
    %c0_21 = arith.constant 0 : index
    %67 = vector.load %arg4[%c32, %c0_21] : memref<128x128xbf16, #tpu.memory_space<vmem>>, vector<32x128xbf16>
    %cst_22 = arith.constant dense<0.000000e+00> : vector<8x128xf32>
    %68 = tpu.matmul %66, %67, %cst_22 {dimension_numbers = #tpu.dot_dimension_numbers<[1], [0], [0], [1], [0, 0, 1, 1], [], []>} : vector<8x32xbf16>, vector<32x128xbf16>, vector<8x128xf32> -> vector<8x128xf32>
    %69 = arith.addf %45, %68 : vector<8x128xf32>
    %70 = vector.extract_strided_slice %17 {offsets = [0, 64], sizes = [8, 32], strides = [1, 1]} : vector<8x128xbf16> to vector<8x32xbf16>
    %71 = vector.extract_strided_slice %21 {offsets = [0, 64], sizes = [8, 32], strides = [1, 1]} : vector<8x128xbf16> to vector<8x32xbf16>
    %72 = vector.extract_strided_slice %22 {offsets = [0, 64], sizes = [8, 32], strides = [1, 1]} : vector<8x128xbf16> to vector<8x32xbf16>
    %cst_23 = arith.constant dense<0.000000e+00> : vector<8x8xf32>
    %73 = tpu.matmul %70, %71, %cst_23 {dimension_numbers = #tpu.dot_dimension_numbers<[1], [1], [0], [0], [0, 0, 1, 0], [], []>} : vector<8x32xbf16>, vector<8x32xbf16>, vector<8x8xf32> -> vector<8x8xf32>
    %cst_24 = arith.constant 0.176776692 : f32
    %74 = vector.broadcast %cst_24 : f32 to vector<8x8xf32>
    %75 = arith.mulf %73, %74 : vector<8x8xf32>
    %cst_25 = arith.constant -1.000000e+30 : f32
    %76 = vector.broadcast %cst_25 : f32 to vector<8x8xf32>
    %77 = arith.select %8, %75, %76 : vector<8x8xi1>, vector<8x8xf32>
    %cst_26 = arith.constant dense<0xFF800000> : vector<8xf32>
    %78 = vector.multi_reduction <maximumf>, %77, %cst_26 [1] : vector<8x8xf32> to vector<8xf32>
    %79 = vector.shape_cast %78 : vector<8xf32> to vector<8x1xf32>
    %80 = vector.broadcast %79 : vector<8x1xf32> to vector<8x8xf32>
    %81 = arith.subf %77, %80 : vector<8x8xf32>
    %82 = math.exp %81 : vector<8x8xf32>
    %cst_27 = arith.constant dense<0.000000e+00> : vector<8xf32>
    %83 = vector.multi_reduction <add>, %82, %cst_27 [1] : vector<8x8xf32> to vector<8xf32>
    %84 = vector.shape_cast %83 : vector<8xf32> to vector<8x1xf32>
    %85 = arith.truncf %82 : vector<8x8xf32> to vector<8x8xbf16>
    %cst_28 = arith.constant dense<0.000000e+00> : vector<8x32xf32>
    %86 = tpu.matmul %85, %72, %cst_28 {dimension_numbers = #tpu.dot_dimension_numbers<[1], [0], [0], [1], [0, 0, 1, 1], [], []>} : vector<8x8xbf16>, vector<8x32xbf16>, vector<8x32xf32> -> vector<8x32xf32>
    %87 = tpu.reciprocal %84 {approx = true} : vector<8x1xf32> -> vector<8x1xf32>
    %88 = vector.broadcast %87 : vector<8x1xf32> to vector<8x32xf32>
    %89 = arith.mulf %86, %88 : vector<8x32xf32>
    %90 = arith.truncf %89 : vector<8x32xf32> to vector<8x32xbf16>
    %c64 = arith.constant 64 : index
    %c0_29 = arith.constant 0 : index
    %91 = vector.load %arg4[%c64, %c0_29] : memref<128x128xbf16, #tpu.memory_space<vmem>>, vector<32x128xbf16>
    %cst_30 = arith.constant dense<0.000000e+00> : vector<8x128xf32>
    %92 = tpu.matmul %90, %91, %cst_30 {dimension_numbers = #tpu.dot_dimension_numbers<[1], [0], [0], [1], [0, 0, 1, 1], [], []>} : vector<8x32xbf16>, vector<32x128xbf16>, vector<8x128xf32> -> vector<8x128xf32>
    %93 = arith.addf %69, %92 : vector<8x128xf32>
    %94 = vector.extract_strided_slice %17 {offsets = [0, 96], sizes = [8, 32], strides = [1, 1]} : vector<8x128xbf16> to vector<8x32xbf16>
    %95 = vector.extract_strided_slice %21 {offsets = [0, 96], sizes = [8, 32], strides = [1, 1]} : vector<8x128xbf16> to vector<8x32xbf16>
    %96 = vector.extract_strided_slice %22 {offsets = [0, 96], sizes = [8, 32], strides = [1, 1]} : vector<8x128xbf16> to vector<8x32xbf16>
    %cst_31 = arith.constant dense<0.000000e+00> : vector<8x8xf32>
    %97 = tpu.matmul %94, %95, %cst_31 {dimension_numbers = #tpu.dot_dimension_numbers<[1], [1], [0], [0], [0, 0, 1, 0], [], []>} : vector<8x32xbf16>, vector<8x32xbf16>, vector<8x8xf32> -> vector<8x8xf32>
    %cst_32 = arith.constant 0.176776692 : f32
    %98 = vector.broadcast %cst_32 : f32 to vector<8x8xf32>
    %99 = arith.mulf %97, %98 : vector<8x8xf32>
    %cst_33 = arith.constant -1.000000e+30 : f32
    %100 = vector.broadcast %cst_33 : f32 to vector<8x8xf32>
    %101 = arith.select %8, %99, %100 : vector<8x8xi1>, vector<8x8xf32>
    %cst_34 = arith.constant dense<0xFF800000> : vector<8xf32>
    %102 = vector.multi_reduction <maximumf>, %101, %cst_34 [1] : vector<8x8xf32> to vector<8xf32>
    %103 = vector.shape_cast %102 : vector<8xf32> to vector<8x1xf32>
    %104 = vector.broadcast %103 : vector<8x1xf32> to vector<8x8xf32>
    %105 = arith.subf %101, %104 : vector<8x8xf32>
    %106 = math.exp %105 : vector<8x8xf32>
    %cst_35 = arith.constant dense<0.000000e+00> : vector<8xf32>
    %107 = vector.multi_reduction <add>, %106, %cst_35 [1] : vector<8x8xf32> to vector<8xf32>
    %108 = vector.shape_cast %107 : vector<8xf32> to vector<8x1xf32>
    %109 = arith.truncf %106 : vector<8x8xf32> to vector<8x8xbf16>
    %cst_36 = arith.constant dense<0.000000e+00> : vector<8x32xf32>
    %110 = tpu.matmul %109, %96, %cst_36 {dimension_numbers = #tpu.dot_dimension_numbers<[1], [0], [0], [1], [0, 0, 1, 1], [], []>} : vector<8x8xbf16>, vector<8x32xbf16>, vector<8x32xf32> -> vector<8x32xf32>
    %111 = tpu.reciprocal %108 {approx = true} : vector<8x1xf32> -> vector<8x1xf32>
    %112 = vector.broadcast %111 : vector<8x1xf32> to vector<8x32xf32>
    %113 = arith.mulf %110, %112 : vector<8x32xf32>
    %114 = arith.truncf %113 : vector<8x32xf32> to vector<8x32xbf16>
    %c96 = arith.constant 96 : index
    %c0_37 = arith.constant 0 : index
    %115 = vector.load %arg4[%c96, %c0_37] : memref<128x128xbf16, #tpu.memory_space<vmem>>, vector<32x128xbf16>
    %cst_38 = arith.constant dense<0.000000e+00> : vector<8x128xf32>
    %116 = tpu.matmul %114, %115, %cst_38 {dimension_numbers = #tpu.dot_dimension_numbers<[1], [0], [0], [1], [0, 0, 1, 1], [], []>} : vector<8x32xbf16>, vector<32x128xbf16>, vector<8x128xf32> -> vector<8x128xf32>
    %117 = arith.addf %93, %116 : vector<8x128xf32>
    %c0_39 = arith.constant 0 : index
    %c0_40 = arith.constant 0 : index
    %118 = vector.load %arg5[%c0_39, %c0_40] : memref<1x128xf32, #tpu.memory_space<vmem>>, vector<1x128xf32>
    %119 = vector.broadcast %118 : vector<1x128xf32> to vector<8x128xf32>
    %120 = arith.addf %117, %119 : vector<8x128xf32>
    %c0_41 = arith.constant 0 : index
    %c0_42 = arith.constant 0 : index
    %121 = vector.load %arg6[%c0_41, %c0_42] : memref<16x128xf32, #tpu.memory_space<vmem>>, vector<8x128xf32>
    tpu.vector_store %arg6[%c0_41, %c0_42], %120 {strides = array<i32>} : memref<16x128xf32, #tpu.memory_space<vmem>>, vector<8x128xf32>,
    %122 = vector.extract_strided_slice %3 {offsets = [8, 0], sizes = [8, 128], strides = [1, 1]} : vector<16x640xf32> to vector<8x128xf32>
    %123 = vector.extract_strided_slice %3 {offsets = [8, 128], sizes = [8, 128], strides = [1, 1]} : vector<16x640xf32> to vector<8x128xf32>
    %124 = vector.extract_strided_slice %3 {offsets = [8, 256], sizes = [8, 128], strides = [1, 1]} : vector<16x640xf32> to vector<8x128xf32>
    %125 = vector.extract_strided_slice %3 {offsets = [8, 384], sizes = [8, 128], strides = [1, 1]} : vector<16x640xf32> to vector<8x128xf32>
    %126 = vector.extract_strided_slice %3 {offsets = [8, 512], sizes = [8, 128], strides = [1, 1]} : vector<16x640xf32> to vector<8x128xf32>
    %127 = arith.mulf %122, %4 : vector<8x128xf32>
    %128 = arith.mulf %123, %5 : vector<8x128xf32>
    %129 = arith.addf %127, %128 : vector<8x128xf32>
    %130 = arith.truncf %129 : vector<8x128xf32> to vector<8x128xbf16>
    %131 = arith.mulf %124, %4 : vector<8x128xf32>
    %132 = arith.mulf %125, %5 : vector<8x128xf32>
    %133 = arith.addf %131, %132 : vector<8x128xf32>
    %134 = arith.truncf %133 : vector<8x128xf32> to vector<8x128xbf16>
    %135 = arith.truncf %126 : vector<8x128xf32> to vector<8x128xbf16>
    %136 = vector.extract_strided_slice %130 {offsets = [0, 0], sizes = [8, 32], strides = [1, 1]} : vector<8x128xbf16> to vector<8x32xbf16>
    %137 = vector.extract_strided_slice %134 {offsets = [0, 0], sizes = [8, 32], strides = [1, 1]} : vector<8x128xbf16> to vector<8x32xbf16>
    %138 = vector.extract_strided_slice %135 {offsets = [0, 0], sizes = [8, 32], strides = [1, 1]} : vector<8x128xbf16> to vector<8x32xbf16>
    %cst_43 = arith.constant dense<0.000000e+00> : vector<8x8xf32>
    %139 = tpu.matmul %136, %137, %cst_43 {dimension_numbers = #tpu.dot_dimension_numbers<[1], [1], [0], [0], [0, 0, 1, 0], [], []>} : vector<8x32xbf16>, vector<8x32xbf16>, vector<8x8xf32> -> vector<8x8xf32>
    %cst_44 = arith.constant 0.176776692 : f32
    %140 = vector.broadcast %cst_44 : f32 to vector<8x8xf32>
    %141 = arith.mulf %139, %140 : vector<8x8xf32>
    %cst_45 = arith.constant -1.000000e+30 : f32
    %142 = vector.broadcast %cst_45 : f32 to vector<8x8xf32>
    %143 = arith.select %8, %141, %142 : vector<8x8xi1>, vector<8x8xf32>
    %cst_46 = arith.constant dense<0xFF800000> : vector<8xf32>
    %144 = vector.multi_reduction <maximumf>, %143, %cst_46 [1] : vector<8x8xf32> to vector<8xf32>
    %145 = vector.shape_cast %144 : vector<8xf32> to vector<8x1xf32>
    %146 = vector.broadcast %145 : vector<8x1xf32> to vector<8x8xf32>
    %147 = arith.subf %143, %146 : vector<8x8xf32>
    %148 = math.exp %147 : vector<8x8xf32>
    %cst_47 = arith.constant dense<0.000000e+00> : vector<8xf32>
    %149 = vector.multi_reduction <add>, %148, %cst_47 [1] : vector<8x8xf32> to vector<8xf32>
    %150 = vector.shape_cast %149 : vector<8xf32> to vector<8x1xf32>
    %151 = arith.truncf %148 : vector<8x8xf32> to vector<8x8xbf16>
    %cst_48 = arith.constant dense<0.000000e+00> : vector<8x32xf32>
    %152 = tpu.matmul %151, %138, %cst_48 {dimension_numbers = #tpu.dot_dimension_numbers<[1], [0], [0], [1], [0, 0, 1, 1], [], []>} : vector<8x8xbf16>, vector<8x32xbf16>, vector<8x32xf32> -> vector<8x32xf32>
    %153 = tpu.reciprocal %150 {approx = true} : vector<8x1xf32> -> vector<8x1xf32>
    %154 = vector.broadcast %153 : vector<8x1xf32> to vector<8x32xf32>
    %155 = arith.mulf %152, %154 : vector<8x32xf32>
    %156 = arith.truncf %155 : vector<8x32xf32> to vector<8x32xbf16>
    %c0_49 = arith.constant 0 : index
    %c0_50 = arith.constant 0 : index
    %157 = vector.load %arg4[%c0_49, %c0_50] : memref<128x128xbf16, #tpu.memory_space<vmem>>, vector<32x128xbf16>
    %cst_51 = arith.constant dense<0.000000e+00> : vector<8x128xf32>
    %158 = tpu.matmul %156, %157, %cst_51 {dimension_numbers = #tpu.dot_dimension_numbers<[1], [0], [0], [1], [0, 0, 1, 1], [], []>} : vector<8x32xbf16>, vector<32x128xbf16>, vector<8x128xf32> -> vector<8x128xf32>
    %159 = vector.extract_strided_slice %130 {offsets = [0, 32], sizes = [8, 32], strides = [1, 1]} : vector<8x128xbf16> to vector<8x32xbf16>
    %160 = vector.extract_strided_slice %134 {offsets = [0, 32], sizes = [8, 32], strides = [1, 1]} : vector<8x128xbf16> to vector<8x32xbf16>
    %161 = vector.extract_strided_slice %135 {offsets = [0, 32], sizes = [8, 32], strides = [1, 1]} : vector<8x128xbf16> to vector<8x32xbf16>
    %cst_52 = arith.constant dense<0.000000e+00> : vector<8x8xf32>
    %162 = tpu.matmul %159, %160, %cst_52 {dimension_numbers = #tpu.dot_dimension_numbers<[1], [1], [0], [0], [0, 0, 1, 0], [], []>} : vector<8x32xbf16>, vector<8x32xbf16>, vector<8x8xf32> -> vector<8x8xf32>
    %cst_53 = arith.constant 0.176776692 : f32
    %163 = vector.broadcast %cst_53 : f32 to vector<8x8xf32>
    %164 = arith.mulf %162, %163 : vector<8x8xf32>
    %cst_54 = arith.constant -1.000000e+30 : f32
    %165 = vector.broadcast %cst_54 : f32 to vector<8x8xf32>
    %166 = arith.select %8, %164, %165 : vector<8x8xi1>, vector<8x8xf32>
    %cst_55 = arith.constant dense<0xFF800000> : vector<8xf32>
    %167 = vector.multi_reduction <maximumf>, %166, %cst_55 [1] : vector<8x8xf32> to vector<8xf32>
    %168 = vector.shape_cast %167 : vector<8xf32> to vector<8x1xf32>
    %169 = vector.broadcast %168 : vector<8x1xf32> to vector<8x8xf32>
    %170 = arith.subf %166, %169 : vector<8x8xf32>
    %171 = math.exp %170 : vector<8x8xf32>
    %cst_56 = arith.constant dense<0.000000e+00> : vector<8xf32>
    %172 = vector.multi_reduction <add>, %171, %cst_56 [1] : vector<8x8xf32> to vector<8xf32>
    %173 = vector.shape_cast %172 : vector<8xf32> to vector<8x1xf32>
    %174 = arith.truncf %171 : vector<8x8xf32> to vector<8x8xbf16>
    %cst_57 = arith.constant dense<0.000000e+00> : vector<8x32xf32>
    %175 = tpu.matmul %174, %161, %cst_57 {dimension_numbers = #tpu.dot_dimension_numbers<[1], [0], [0], [1], [0, 0, 1, 1], [], []>} : vector<8x8xbf16>, vector<8x32xbf16>, vector<8x32xf32> -> vector<8x32xf32>
    %176 = tpu.reciprocal %173 {approx = true} : vector<8x1xf32> -> vector<8x1xf32>
    %177 = vector.broadcast %176 : vector<8x1xf32> to vector<8x32xf32>
    %178 = arith.mulf %175, %177 : vector<8x32xf32>
    %179 = arith.truncf %178 : vector<8x32xf32> to vector<8x32xbf16>
    %c32_58 = arith.constant 32 : index
    %c0_59 = arith.constant 0 : index
    %180 = vector.load %arg4[%c32_58, %c0_59] : memref<128x128xbf16, #tpu.memory_space<vmem>>, vector<32x128xbf16>
    %cst_60 = arith.constant dense<0.000000e+00> : vector<8x128xf32>
    %181 = tpu.matmul %179, %180, %cst_60 {dimension_numbers = #tpu.dot_dimension_numbers<[1], [0], [0], [1], [0, 0, 1, 1], [], []>} : vector<8x32xbf16>, vector<32x128xbf16>, vector<8x128xf32> -> vector<8x128xf32>
    %182 = arith.addf %158, %181 : vector<8x128xf32>
    %183 = vector.extract_strided_slice %130 {offsets = [0, 64], sizes = [8, 32], strides = [1, 1]} : vector<8x128xbf16> to vector<8x32xbf16>
    %184 = vector.extract_strided_slice %134 {offsets = [0, 64], sizes = [8, 32], strides = [1, 1]} : vector<8x128xbf16> to vector<8x32xbf16>
    %185 = vector.extract_strided_slice %135 {offsets = [0, 64], sizes = [8, 32], strides = [1, 1]} : vector<8x128xbf16> to vector<8x32xbf16>
    %cst_61 = arith.constant dense<0.000000e+00> : vector<8x8xf32>
    %186 = tpu.matmul %183, %184, %cst_61 {dimension_numbers = #tpu.dot_dimension_numbers<[1], [1], [0], [0], [0, 0, 1, 0], [], []>} : vector<8x32xbf16>, vector<8x32xbf16>, vector<8x8xf32> -> vector<8x8xf32>
    %cst_62 = arith.constant 0.176776692 : f32
    %187 = vector.broadcast %cst_62 : f32 to vector<8x8xf32>
    %188 = arith.mulf %186, %187 : vector<8x8xf32>
    %cst_63 = arith.constant -1.000000e+30 : f32
    %189 = vector.broadcast %cst_63 : f32 to vector<8x8xf32>
    %190 = arith.select %8, %188, %189 : vector<8x8xi1>, vector<8x8xf32>
    %cst_64 = arith.constant dense<0xFF800000> : vector<8xf32>
    %191 = vector.multi_reduction <maximumf>, %190, %cst_64 [1] : vector<8x8xf32> to vector<8xf32>
    %192 = vector.shape_cast %191 : vector<8xf32> to vector<8x1xf32>
    %193 = vector.broadcast %192 : vector<8x1xf32> to vector<8x8xf32>
    %194 = arith.subf %190, %193 : vector<8x8xf32>
    %195 = math.exp %194 : vector<8x8xf32>
    %cst_65 = arith.constant dense<0.000000e+00> : vector<8xf32>
    %196 = vector.multi_reduction <add>, %195, %cst_65 [1] : vector<8x8xf32> to vector<8xf32>
    %197 = vector.shape_cast %196 : vector<8xf32> to vector<8x1xf32>
    %198 = arith.truncf %195 : vector<8x8xf32> to vector<8x8xbf16>
    %cst_66 = arith.constant dense<0.000000e+00> : vector<8x32xf32>
    %199 = tpu.matmul %198, %185, %cst_66 {dimension_numbers = #tpu.dot_dimension_numbers<[1], [0], [0], [1], [0, 0, 1, 1], [], []>} : vector<8x8xbf16>, vector<8x32xbf16>, vector<8x32xf32> -> vector<8x32xf32>
    %200 = tpu.reciprocal %197 {approx = true} : vector<8x1xf32> -> vector<8x1xf32>
    %201 = vector.broadcast %200 : vector<8x1xf32> to vector<8x32xf32>
    %202 = arith.mulf %199, %201 : vector<8x32xf32>
    %203 = arith.truncf %202 : vector<8x32xf32> to vector<8x32xbf16>
    %c64_67 = arith.constant 64 : index
    %c0_68 = arith.constant 0 : index
    %204 = vector.load %arg4[%c64_67, %c0_68] : memref<128x128xbf16, #tpu.memory_space<vmem>>, vector<32x128xbf16>
    %cst_69 = arith.constant dense<0.000000e+00> : vector<8x128xf32>
    %205 = tpu.matmul %203, %204, %cst_69 {dimension_numbers = #tpu.dot_dimension_numbers<[1], [0], [0], [1], [0, 0, 1, 1], [], []>} : vector<8x32xbf16>, vector<32x128xbf16>, vector<8x128xf32> -> vector<8x128xf32>
    %206 = arith.addf %182, %205 : vector<8x128xf32>
    %207 = vector.extract_strided_slice %130 {offsets = [0, 96], sizes = [8, 32], strides = [1, 1]} : vector<8x128xbf16> to vector<8x32xbf16>
    %208 = vector.extract_strided_slice %134 {offsets = [0, 96], sizes = [8, 32], strides = [1, 1]} : vector<8x128xbf16> to vector<8x32xbf16>
    %209 = vector.extract_strided_slice %135 {offsets = [0, 96], sizes = [8, 32], strides = [1, 1]} : vector<8x128xbf16> to vector<8x32xbf16>
    %cst_70 = arith.constant dense<0.000000e+00> : vector<8x8xf32>
    %210 = tpu.matmul %207, %208, %cst_70 {dimension_numbers = #tpu.dot_dimension_numbers<[1], [1], [0], [0], [0, 0, 1, 0], [], []>} : vector<8x32xbf16>, vector<8x32xbf16>, vector<8x8xf32> -> vector<8x8xf32>
    %cst_71 = arith.constant 0.176776692 : f32
    %211 = vector.broadcast %cst_71 : f32 to vector<8x8xf32>
    %212 = arith.mulf %210, %211 : vector<8x8xf32>
    %cst_72 = arith.constant -1.000000e+30 : f32
    %213 = vector.broadcast %cst_72 : f32 to vector<8x8xf32>
    %214 = arith.select %8, %212, %213 : vector<8x8xi1>, vector<8x8xf32>
    %cst_73 = arith.constant dense<0xFF800000> : vector<8xf32>
    %215 = vector.multi_reduction <maximumf>, %214, %cst_73 [1] : vector<8x8xf32> to vector<8xf32>
    %216 = vector.shape_cast %215 : vector<8xf32> to vector<8x1xf32>
    %217 = vector.broadcast %216 : vector<8x1xf32> to vector<8x8xf32>
    %218 = arith.subf %214, %217 : vector<8x8xf32>
    %219 = math.exp %218 : vector<8x8xf32>
    %cst_74 = arith.constant dense<0.000000e+00> : vector<8xf32>
    %220 = vector.multi_reduction <add>, %219, %cst_74 [1] : vector<8x8xf32> to vector<8xf32>
    %221 = vector.shape_cast %220 : vector<8xf32> to vector<8x1xf32>
    %222 = arith.truncf %219 : vector<8x8xf32> to vector<8x8xbf16>
    %cst_75 = arith.constant dense<0.000000e+00> : vector<8x32xf32>
    %223 = tpu.matmul %222, %209, %cst_75 {dimension_numbers = #tpu.dot_dimension_numbers<[1], [0], [0], [1], [0, 0, 1, 1], [], []>} : vector<8x8xbf16>, vector<8x32xbf16>, vector<8x32xf32> -> vector<8x32xf32>
    %224 = tpu.reciprocal %221 {approx = true} : vector<8x1xf32> -> vector<8x1xf32>
    %225 = vector.broadcast %224 : vector<8x1xf32> to vector<8x32xf32>
    %226 = arith.mulf %223, %225 : vector<8x32xf32>
    %227 = arith.truncf %226 : vector<8x32xf32> to vector<8x32xbf16>
    %c96_76 = arith.constant 96 : index
    %c0_77 = arith.constant 0 : index
    %228 = vector.load %arg4[%c96_76, %c0_77] : memref<128x128xbf16, #tpu.memory_space<vmem>>, vector<32x128xbf16>
    %cst_78 = arith.constant dense<0.000000e+00> : vector<8x128xf32>
    %229 = tpu.matmul %227, %228, %cst_78 {dimension_numbers = #tpu.dot_dimension_numbers<[1], [0], [0], [1], [0, 0, 1, 1], [], []>} : vector<8x32xbf16>, vector<32x128xbf16>, vector<8x128xf32> -> vector<8x128xf32>
    %230 = arith.addf %206, %229 : vector<8x128xf32>
    %c0_79 = arith.constant 0 : index
    %c0_80 = arith.constant 0 : index
    %231 = vector.load %arg5[%c0_79, %c0_80] : memref<1x128xf32, #tpu.memory_space<vmem>>, vector<1x128xf32>
    %232 = vector.broadcast %231 : vector<1x128xf32> to vector<8x128xf32>
    %233 = arith.addf %230, %232 : vector<8x128xf32>
    %c8 = arith.constant 8 : index
    %c0_81 = arith.constant 0 : index
    %234 = vector.load %arg6[%c8, %c0_81] : memref<16x128xf32, #tpu.memory_space<vmem>>, vector<8x128xf32>
    tpu.vector_store %arg6[%c8, %c0_81], %233 {strides = array<i32>} : memref<16x128xf32, #tpu.memory_space<vmem>>, vector<8x128xf32>,
    return
  }
  func.func @transform_0(%arg0: i32) -> (i32, i32) {
    %c0_i32 = arith.constant 0 : i32
    %c0_i32_0 = arith.constant 0 : i32
    %c0_i32_1 = arith.constant 0 : i32
    return %c0_i32, %c0_i32_0 : i32, i32
  }
  func.func @transform_1(%arg0: i32) -> (i32, i32) {
    %c0_i32 = arith.constant 0 : i32
    %c0_i32_0 = arith.constant 0 : i32
    %c0_i32_1 = arith.constant 0 : i32
    return %c0_i32, %c0_i32_0 : i32, i32
  }
  func.func @transform_2(%arg0: i32) -> (i32, i32) {
    %c0_i32 = arith.constant 0 : i32
    %c0_i32_0 = arith.constant 0 : i32
    %c0_i32_1 = arith.constant 0 : i32
    return %c0_i32, %c0_i32_0 : i32, i32
  }
  func.func @transform_3(%arg0: i32) -> (i32, i32) {
    %c0_i32 = arith.constant 0 : i32
    %c0_i32_0 = arith.constant 0 : i32
    %c0_i32_1 = arith.constant 0 : i32
    return %c0_i32, %c0_i32_0 : i32, i32
  }
  func.func @transform_4(%arg0: i32) -> (i32, i32) {
    %c0_i32 = arith.constant 0 : i32
    %c0_i32_0 = arith.constant 0 : i32
    %c0_i32_1 = arith.constant 0 : i32
    return %c0_i32, %c0_i32_0 : i32, i32
  }
  func.func @transform_5(%arg0: i32) -> (i32, i32) {
    %c0_i32 = arith.constant 0 : i32
    %c0_i32_0 = arith.constant 0 : i32
    %c0_i32_1 = arith.constant 0 : i32
    return %c0_i32, %c0_i32_0 : i32, i32
  }
}

</mosaic_0001>

<bundles_post_ra>
// kernel: tpu_custom_call.1
= control target key start
LH: loop header
LB: loop body
LE: loop exit
PB: predicated region body
PF: predicated region fallthrough
CT: control target
= control target key end

     0   :  { %10 = vsyncpa [#allocation3], 0  ;;  %s2555_s0 = inlined_call_operand.hbm [shape: f32[16,32], index: 0, kind: input, shape index: {}]   ;;  %s2556_s1 = inlined_call_operand.hbm [shape: bf16[32,640], index: 1, kind: input, shape index: {}]   ;;  %s2557_s2 = inlined_call_operand.hbm [shape: f32[8,256], index: 2, kind: input, shape index: {}]   ;;  %s2558_s3 = inlined_call_operand.hbm [shape: bf16[128,128], index: 3, kind: input, shape index: {}]   ;;  %s2559_s4 = inlined_call_operand.vmem [shape: f32[1,128], index: 4, kind: input, shape index: {}]   ;;  %s2560_s5 = inlined_call_operand.hbm [shape: f32[16,128], index: 5, kind: output, shape index: {}]  }
   0x1   :  { %11 = vsyncpa [#allocation6], 0 }
   0x2   :  { %12 = vsyncpa [#allocation9], 0 }
   0x3   :  { %13 = vsyncpa [#allocation4], 0  ;;  %s2189_s18 = smov [#allocation5]   ;;  %s2071_s22 = scalar_lea.hbm %s2556_s1, 1280 }
   0x4   :  { %s31_s19 = sshll.u32 %s2189_s18, 4  ;;  %p2072_p0 = scmp.ne.s32.totalorder %s2556_s1, %s2071_s22  ;;  %s32_s19 = int_to_ptr.vmem [resolvable:$true] %s31_s19 }
   0x5   :  { %p2075_p1 = scmp.lt.u32.totalorder %s2071_s22, %s2556_s1 }
   0x7   :  { %p2077_p2 = pnand %p2075_p1, %p2072_p0 }
   0x9   :  { %2080 = shalt.err (!%p2077_p2)
}
   0xa   :  { %s2081_s27 = scalar_lea.vmem %s32_s19, 1280  ;;  %p2086_p4 = scmp.lt.s32.totalorder %s32_s19, %s32_s19 }
   0xb   :  { %p2082_p3 = scmp.ne.s32.totalorder %s32_s19, %s2081_s27  ;;  %p2087_p5 = scmp.lt.s32.totalorder %s2081_s27, %s2081_s27 }
   0xd   :  { %p2088_p6 = por %p2087_p5, %p2086_p4 }
   0xf   :  { %p2089_p7 = pnand %p2088_p6, %p2082_p3 }
  0x11   :  { %2092 = shalt.err (!%p2089_p7)
}
  0x12   :  { %s2190_s28 = smov 320   ;;  %s2191_s29 = smov 20  }
  0x13   :  { %37 = dma.hbm_to_vmem [thread:$0]  %s2556_s1, 1280, %s32_s19, [#allocation6], %s2190_s28, %s2190_s28, %s2191_s29  }
  0x14   :  { %s2192_s7 = smov [#allocation2]   ;;  %s2093_s11 = scalar_lea.hbm %s2555_s0, 256 }
  0x15   :  { %s19_s8 = sshll.u32 %s2192_s7, 4  ;;  %p2094_p8 = scmp.ne.s32.totalorder %s2555_s0, %s2093_s11  ;;  %s20_s8 = int_to_ptr.vmem [resolvable:$true] %s19_s8 }
  0x16   :  { %p2097_p9 = scmp.lt.u32.totalorder %s2093_s11, %s2555_s0 }
  0x18   :  { %p2099_p10 = pnand %p2097_p9, %p2094_p8 }
  0x1a   :  { %2102 = shalt.err (!%p2099_p10)
}
  0x1b   :  { %s2103_s16 = scalar_lea.vmem %s20_s8, 256  ;;  %p2108_p12 = scmp.lt.s32.totalorder %s20_s8, %s20_s8 }
  0x1c   :  { %p2104_p11 = scmp.ne.s32.totalorder %s20_s8, %s2103_s16  ;;  %p2109_p13 = scmp.lt.s32.totalorder %s2103_s16, %s2103_s16 }
  0x1e   :  { %p2110_p0 = por %p2109_p13, %p2108_p12 }
  0x20   :  { %p2111_p1 = pnand %p2110_p0, %p2104_p11 }
  0x22   :  { %2114 = shalt.err (!%p2111_p1)
}
  0x23   :  { %s2193_s1 = smov 128   ;;  %s2194_s17 = smov 8  }
  0x24   :  { %25 = dma.hbm_to_vmem [thread:$0]  %s2555_s0, 256, %s20_s8, [#allocation3], %s2193_s1, %s2193_s1, %s2194_s17  }
  0x25   :  { %s2195_s20 = smov [#allocation7]   ;;  %s2196_s22 = smov [#allocation8]  }
  0x26   :  { %s44_s21 = sshll.u32 %s2195_s20, 4  ;;  %s53_s23 = sshll.u32 %s2196_s22, 4  ;;  %s45_s21 = int_to_ptr.vmem [resolvable:$true] %s44_s21  ;;  %s2262_s23 = int_to_ptr.vmem [resolvable:$true] %s53_s23 }
  0x27   :  { %s2115_s26 = scalar_lea.hbm %s2557_s2, 256 }
  0x28   :  { %p2116_p2 = scmp.ne.s32.totalorder %s2557_s2, %s2115_s26  ;;  %p2119_p3 = scmp.lt.u32.totalorder %s2115_s26, %s2557_s2 }
  0x2a   :  { %p2121_p4 = pnand %p2119_p3, %p2116_p2 }
  0x2c   :  { %2124 = shalt.err (!%p2121_p4)
}
  0x2d   :  { %s2125_s0 = scalar_lea.vmem %s45_s21, 256  ;;  %p2130_p6 = scmp.lt.s32.totalorder %s45_s21, %s45_s21 }
  0x2e   :  { %p2126_p5 = scmp.ne.s32.totalorder %s45_s21, %s2125_s0  ;;  %p2131_p7 = scmp.lt.s32.totalorder %s2125_s0, %s2125_s0 }
  0x30   :  { %p2132_p8 = por %p2131_p7, %p2130_p6 }
  0x32   :  { %p2133_p9 = pnand %p2132_p8, %p2126_p5 }
  0x34   :  { %2136 = shalt.err (!%p2133_p9)
}
  0x35   :  { %47 = dma.hbm_to_vmem [thread:$0]  %s2557_s2, 256, %s45_s21, [#allocation6]  }
  0x36   :  { %s2137_s10 = scalar_lea.hbm %s2558_s3, 1024 }
  0x37   :  { %p2138_p10 = scmp.ne.s32.totalorder %s2558_s3, %s2137_s10  ;;  %p2141_p11 = scmp.lt.u32.totalorder %s2137_s10, %s2558_s3 }
  0x39   :  { %p2143_p12 = pnand %p2141_p11, %p2138_p10 }
  0x3b   :  { %2146 = shalt.err (!%p2143_p12)
}
  0x3c   :  { %s2147_s15 = scalar_lea.vmem %s2262_s23, 1024  ;;  %p2152_p0 = scmp.lt.s32.totalorder %s2262_s23, %s2262_s23 }
  0x3d   :  { %p2148_p13 = scmp.ne.s32.totalorder %s2262_s23, %s2147_s15  ;;  %p2153_p1 = scmp.lt.s32.totalorder %s2147_s15, %s2147_s15 }
  0x3f   :  { %p2154_p2 = por %p2153_p1, %p2152_p0 }
  0x41   :  { %p2155_p3 = pnand %p2154_p2, %p2148_p13 }
  0x43   :  { %2158 = shalt.err (!%p2155_p3)
}
  0x44   :  { %s2197_s2 = smov 64   ;;  %s2198_s16 = smov 4  }
  0x45   :  { %59 = dma.hbm_to_vmem [thread:$0]  %s2558_s3, 1024, %s2262_s23, [#allocation9], %s2197_s2, %s2197_s2, %s2198_s16  }
  0x46   :  { %2181 = dma.done.wait [#allocation3], 256  }
  0x47   :  { %2182 = vsyncadd [#allocation3], 4294967040 }
  0x48   :  { %2183 = dma.done.wait [#allocation6], 1536  }
  0x49   :  { %2184 = vsyncadd [#allocation6], 4294965760 }
  0x4a   :  { %2185 = dma.done.wait [#allocation9], 1024  }
  0x4b   :  { %2186 = vsyncadd [#allocation9], 4294966272  ;;  %v2199_v0 = vmov 0   ;;  %v2009_v1 = vld [vmem:[#allocation5 + $0xc] ss:$20 sps:$4 sm:$0xff]   ;;  %v75_v8 = vld [vmem:[#allocation2] sm:$0xff]  ;;  %v275_v46 = vlaneseq }
  0x4c   :  { %221 = vmatprep.mubr.bf16.mxu1 %v2199_v0  ;;  %178 = vmatprep.mubr.bf16.mxu0 %v2199_v0  ;;  %v2011_v2 = vld [vmem:[#allocation5 + $0x8] ss:$20 sps:$4 sm:$0xff]   ;;  %v2012_v3 = vld [vmem:[#allocation5 + $0x4] ss:$20 sps:$4 sm:$0xff]   ;;  %v2016_v5 = vld [vmem:[#allocation5] ss:$20 sps:$4 sm:$0xff]  }
  0x4d   :  { %189 = vmatprep.subr.bf16.mxu1 %v2009_v1  ;;  %v2014_v4 = vld [vmem:[#allocation5 + $0x34] ss:$20 sps:$4 sm:$0xff]   ;;  %v2017_v6 = vld [vmem:[#allocation5 + $0x30] ss:$20 sps:$4 sm:$0xff]   ;;  %146 = vmatprep.subr.bf16.mxu0 %v2012_v3  ;;  %v2018_v7 = vld [vmem:[#allocation5 + $0x2c] ss:$20 sps:$4 sm:$0xff]  }
  0x4e   :  { %190 = vmatpush1.bf16.msra.mxu1 %v2011_v2  ;;  %147 = vmatpush1.bf16.msra.mxu0 %v2016_v5  ;;  %v76_v9 = vld [vmem:[#allocation2 + $0x8] sm:$0xff]  ;;  %vm142_vm0 = vcmask 261120   ;;  %v2021_v12 = vld [vmem:[#allocation5 + $0x10] ss:$20 sps:$4 sm:$0xff]   ;;  %v2200_v13 = vmov 0.0   ;;  %vm2201_vm1 = vmmov 0  }
  0x4f   :  { %191 = vmatprep.subr.bf16.mxu1 %v2014_v4  ;;  %v2020_v10 = vld [vmem:[#allocation5 + $0x28] ss:$20 sps:$4 sm:$0xff]   ;;  %148 = vmatprep.subr.bf16.mxu0 %v2018_v7  ;;  %v77_v11 = vpack.c.bf16 %v76_v9, %v75_v8  ;;  %v2022_v14 = vld [vmem:[#allocation5 + $0x38] ss:$20 sps:$4 sm:$0xff]   ;;  %v273_v15 = vld [vmem:[#allocation7] sm:$0xff]  ;;  %s2202_s3 = smov 96  }
  0x50   :  { %v274_v16 = vld [vmem:[#allocation7 + $0x8] sm:$0xff]  ;;  %v276_v47 = vshrl.u32 %v275_v46, 7  ;;  %v278_v48 = vand.u32 127, %v275_v46  ;;  %vm337_vm3 = vcmask 64512   ;;  %vm351_vm4 = vcmask 1043456   ;;  %s2203_s20 = smov 32  }
  0x51   :  { %v2037_v50 = vld [vmem:[#allocation8 + $0x30] sm:$0xff]  }
  0x52   :  { %192 = vmatpush1.bf16.msra.mxu1 %v2017_v6  ;;  %149 = vmatpush1.bf16.msra.mxu0 %v2020_v10  ;;  %vm2338_vm2 = vcmp.le.s32.totalorder %v278_v48, %v276_v47 }
  0x53   :  { %1833 = vmatprep.subr.bf16.mxu1 %v2200_v13  ;;  %1825 = vmatprep.subr.bf16.mxu0 %v2200_v13 }
  0x55   :  { %1722 = vmatmul.mubr.msk.bf16.vlgmr.msra.gmra.mrb[0].mxu1 %vm142_vm0, %v77_v11  ;;  %1721 = vmatmul.mubr.msk.bf16.vlgmr.msra.gmra.mrb[0].mxu0 %vm142_vm0, %v77_v11 }
  0x56   :  { %1835 = vmatprep.mubr.msk.bf16.mxu1 %vm2201_vm1, %v2200_v13  ;;  %1826 = vmatpush3.bf16.msra.mxu0 %v2021_v12 }
  0x57   :  { %1829 = vmatprep.mubr.msk.bf16.mxu0 %vm2201_vm1, %v2200_v13  ;;  %1827 = vmatprep.subr.bf16.mxu0 %v2200_v13 }
  0x5a   :  { %1828 = vmatpush3.bf16.msra.mxu0 %v2022_v14 }
  0x5b   :  { %1839 = vmatprep.subr.bf16.mxu0 %v2200_v13 }
  0x5d   :  { %1830 = vmatmul.mubr.msk.bf16.vlgmr.msra.gmra.mrb[4].mxu0 %vm142_vm0, %v77_v11 }
  0x5e   :  { %1841 = vmatprep.mubr.msk.bf16.mxu0 %vm2201_vm1, %v2200_v13 }
 0x128   :  { %v223_v17 = vpop.f32.mrb[0].mxu1  ;;  %v180_v22 = vpop.f32.mrb[0].mxu0 }
 0x129   :  { %v284_v18 = vmul.f32 %v273_v15, %v223_v17  ;;  %v225_v19 = vpop.f32.mrb[1].mxu1  ;;  %v280_v25 = vmul.f32 %v273_v15, %v180_v22  ;;  %v182_v26 = vpop.f32.mrb[1].mxu0 }
 0x12a   :  { %v285_v20 = vmul.f32 %v274_v16, %v225_v19  ;;  %v227_v21 = vpop.f32.mrb[2].mxu1  ;;  %v281_v29 = vmul.f32 %v274_v16, %v182_v26  ;;  %v184_v30 = vpop.f32.mrb[2].mxu0  ;;  %v2024_v19 = vld [vmem:[#allocation8 + $0x8] sm:$0xff]  }
 0x12b   :  { %v991_v23 = vmul.f32 %v273_v15, %v227_v21  ;;  %v229_v24 = vpop.f32.mrb[3].mxu1  ;;  %v987_v31 = vmul.f32 %v273_v15, %v184_v30  ;;  %v186_v32 = vpop.f32.mrb[3].mxu0  ;;  %v2026_v21 = vld [vmem:[#allocation8 + $0x18] sm:$0xff]  }
 0x12c   :  { %v286_v27 = vadd.f32 %v285_v20, %v284_v18  ;;  %v992_v28 = vmul.f32 %v274_v16, %v229_v24  ;;  %v282_v35 = vadd.f32 %v281_v29, %v280_v25  ;;  %v988_v36 = vmul.f32 %v274_v16, %v186_v32  ;;  %v2023_v16 = vld [vmem:[#allocation8] sm:$0xff]   ;;  %v2025_v20 = vld [vmem:[#allocation8 + $0x10] sm:$0xff]  }
 0x12e   :  { %v2308_v33 = vpack.c.bf16 %v286_v27, %v286_v27  ;;  %v2310_v34 = vadd.f32 %v992_v28, %v991_v23  ;;  %v2312_v37 = vpack.c.bf16 %v282_v35, %v282_v35  ;;  %v2316_v38 = vadd.f32 %v988_v36, %v987_v31 }
 0x130   :  { %406 = vrot.lane.b32.xlu0 %v2308_v33, %s2202_s3  ;;  %v293_v39 = vsel %vm142_vm0, %v2308_v33, 0  ;;  %v266_v40 = vpop.f32.mrb[4].mxu0 }
 0x131   :  { %1834 = vmatpush3.bf16.xpose.msra.mxu1 %v293_v39  ;;  %v1831_v41 = vpop.f32.mrb[5].mxu0  ;;  %v2323_v42 = vpack.c.bf16 %v266_v40, %v266_v40 }
 0x132   :  { %1845 = vmatprep.subr.bf16.mxu1 %v2200_v13  ;;  %v2345_v57 = vpop.f32.mrb[6].mxu0 }
 0x133   :  { %v353_v58 = vsel %vm351_vm4, %v2323_v42, 0  ;;  %v1832_v59 = vpop.f32.mrb[7].mxu0 }
 0x134   :  { %403 = vrot.lane.b32.xlu0 %v2312_v37, %s2202_s3  ;;  %1840 = vmatpush3.bf16.msra.mxu0 %v353_v58 }
 0x135   :  { %1851 = vmatprep.subr.bf16.mxu0 %v2200_v13 }
 0x138   :  { %1836 = vmatmul.mubr.msk.bf16.vlgmr.msra.gmra.mrb[4].mxu1 %vm142_vm0, %v2312_v37  ;;  %467 = vrot.lane.b32.xlu0 %v2323_v42, %s2202_s3 }
 0x139   :  { %1847 = vmatprep.mubr.msk.bf16.mxu1 %vm2201_vm1, %v2200_v13 }
 0x13c   :  { %634 = vrot.lane.b32.xlu0 %v2308_v33, %s2197_s2 }
 0x1a2   :  { %v407_v43 = vpop.permute.xlu0 %406 }
 0x1a3   :  { %v412_v44 = vsel %vm142_vm0, %v407_v43, 0 }
 0x1a4   :  { %1846 = vmatpush3.bf16.xpose.msra.mxu1 %v412_v44 }
 0x1a5   :  { %1857 = vmatprep.subr.bf16.mxu1 %v2200_v13 }
 0x1a6   :  { %v404_v45 = vpop.permute.xlu0 %403 }
 0x1aa   :  { %v468_v7 = vpop.permute.xlu0 %467 }
 0x1ab   :  { %1848 = vmatmul.mubr.msk.bf16.vlgmr.msra.gmra.mrb[8].mxu1 %vm142_vm0, %v404_v45  ;;  %v473_v8 = vsel %vm351_vm4, %v468_v7, 0 }
 0x1ac   :  { %1861 = vmatprep.mubr.msk.bf16.mxu1 %vm2201_vm1, %v2200_v13  ;;  %1858 = vmatpush3.bf16.msra.mxu1 %v2025_v20 }
 0x1ad   :  { %1859 = vmatprep.subr.bf16.mxu1 %v2200_v13 }
 0x1ae   :  { %v635_v22 = vpop.permute.xlu0 %634 }
 0x1af   :  { %v640_v45 = vsel %vm142_vm0, %v635_v22, 0 }
 0x1b0   :  { %1860 = vmatpush3.bf16.msra.mxu1 %v2026_v21 }
 0x1b1   :  { %1873 = vmatprep.subr.bf16.mxu1 %v2200_v13 }
 0x20b   :  { %v329_v49 = vpop.f32.mrb[4].mxu1 }
 0x20c   :  { %v335_v51 = vmul.f32 0.17677669, %v329_v49  ;;  %v1837_v52 = vpop.f32.mrb[5].mxu1 }
 0x20d   :  { %v332_v53 = vpop.f32.mrb[6].mxu1 }
 0x20e   :  { %v1838_v54 = vpop.f32.mrb[7].mxu1  ;;  %v336_v55 = vsel %vm2338_vm2, %v335_v51, -1e+30 }
 0x20f   :  { %v338_v56 = vsel %vm337_vm3, %v336_v55, -inf }
 0x210   :  { %339 = vmax.xlane.f32.xlu1 %v338_v56 }
 0x27e   :  { %v448_v60 = vpop.f32.mrb[8].mxu1 }
 0x27f   :  { %v454_v61 = vmul.f32 0.17677669, %v448_v60  ;;  %v1849_v62 = vpop.f32.mrb[9].mxu1 }
 0x280   :  { %v451_v63 = vpop.f32.mrb[10].mxu1 }
 0x281   :  { %v1850_v0 = vpop.f32.mrb[11].mxu1  ;;  %v455_v1 = vsel %vm2338_vm2, %v454_v61, -1e+30 }
 0x282   :  { %v456_v2 = vsel %vm337_vm3, %v455_v1, -inf }
 0x283   :  { %457 = vmax.xlane.f32.xlu1 %v456_v2 }
 0x29d   :  { %v340_v3 = vpop.xlane.xlu1 %339 }
 0x29e   :  { %v341_v4 = vsub.f32 %v336_v55, %v340_v3 }
 0x2a0   :  { %v342_v5 = vmul.f32 1.442695, %v341_v4 }
 0x2a2   :  { %2039 = vpow2.f32 %v342_v5 }
 0x2ac   :  { %v2040_v6 = vpop.eup %2039 }
 0x2ad   :  { %v344_v9 = vsel %vm337_vm3, %v2040_v6, 0.0  ;;  %v347_v10 = vpack.c.bf16 %v2040_v6, %v2040_v6 }
 0x2ae   :  { %345 = vadd.xlane.f32.xlu0 %v344_v9  ;;  %v2027_v9 = vld [vmem:[#allocation8 + $0x20] sm:$0xff]  }
 0x2af   :  { %1842 = vmatmul.mubr.msk.bf16.vlgmr.msra.gmra.mrb[8].mxu0 %vm337_vm3, %v347_v10  ;;  %v2406_v10 = vpack.c.bf16 %v2316_v38, %v2316_v38 }
 0x2b0   :  { %1852 = vmatpush3.bf16.msra.mxu0 %v473_v8  ;;  %1853 = vmatprep.mubr.msk.bf16.mxu0 %vm2201_vm1, %v2200_v13 }
 0x2b1   :  { %1865 = vmatprep.subr.bf16.mxu0 %v2200_v13 }
 0x2c4   :  { %694 = vrot.lane.b32.xlu0 %v2323_v42, %s2197_s2 }
 0x2c8   :  { %805 = vrot.lane.b32.xlu0 %v2312_v37, %s2203_s20 }
 0x310   :  { %v458_v11 = vpop.xlane.xlu1 %457 }
 0x311   :  { %v459_v12 = vsub.f32 %v455_v1, %v458_v11  ;;  %v2028_v11 = vld [vmem:[#allocation8 + $0x28] sm:$0xff]  }
 0x313   :  { %v460_v14 = vmul.f32 1.442695, %v459_v12 }
 0x315   :  { %2041 = vpow2.f32 %v460_v14 }
 0x31f   :  { %v2042_v15 = vpop.eup %2041 }
 0x320   :  { %v462_v17 = vsel %vm337_vm3, %v2042_v15, 0.0  ;;  %v465_v18 = vpack.c.bf16 %v2042_v15, %v2042_v15 }
 0x321   :  { %463 = vadd.xlane.f32.xlu1 %v462_v17 }
 0x322   :  { %1854 = vmatmul.mubr.msk.bf16.vlgmr.msra.gmra.mrb[12].mxu0 %vm337_vm3, %v465_v18 }
 0x323   :  { %1866 = vmatpush3.bf16.msra.mxu0 %v2023_v16  ;;  %1869 = vmatprep.mubr.msk.bf16.mxu0 %vm2201_vm1, %v2200_v13 }
 0x324   :  { %1867 = vmatprep.subr.bf16.mxu0 %v2200_v13 }
 0x327   :  { %1868 = vmatpush3.bf16.msra.mxu0 %v2024_v19 }
 0x328   :  { %1879 = vmatprep.subr.bf16.mxu0 %v2200_v13 }
 0x332   :  { %632 = vrot.lane.b32.xlu1 %v2312_v37, %s2197_s2 }
 0x33b   :  { %v346_v23 = vpop.xlane.xlu0 %345 }
 0x33c   :  { %2043 = vrcp.f32 %v346_v23 }
 0x33f   :  { %v695_v28 = vpop.permute.xlu0 %694 }
 0x340   :  { %v700_v32 = vsel %vm351_vm4, %v695_v28, 0  ;;  %v2422_v28 = vpack.c.bf16 %v2310_v34, %v2310_v34 }
 0x346   :  { %v2044_v24 = vpop.eup %2043 }
 0x382   :  { %v389_v25 = vpop.f32.mrb[8].mxu0 }
 0x383   :  { %v396_v26 = vmul.f32 %v2044_v24, %v389_v25  ;;  %v1843_v27 = vpop.f32.mrb[9].mxu0 }
 0x384   :  { %v392_v29 = vpop.f32.mrb[10].mxu0 }
 0x385   :  { %v397_v30 = vpack.c.bf16 %v396_v26, %v396_v26  ;;  %v1844_v31 = vpop.f32.mrb[11].mxu0 }
 0x387   :  { %1870 = vmatmul.mubr.msk.bf16.vlgmr.msra.gmra.mrb[16].mxu0 %vm142_vm0, %v397_v30 }
 0x388   :  { %1880 = vmatpush3.bf16.msra.mxu0 %v700_v32  ;;  %1881 = vmatprep.mubr.msk.bf16.mxu0 %vm2201_vm1, %v2200_v13 }
 0x389   :  { %1893 = vmatprep.subr.bf16.mxu0 %v2200_v13 }
 0x3ae   :  { %v464_v35 = vpop.xlane.xlu1 %463 }
 0x3af   :  { %2045 = vrcp.f32 %v464_v35 }
 0x3b2   :  { %v633_v46 = vpop.permute.xlu1 %632 }
 0x3b9   :  { %v2046_v36 = vpop.eup %2045 }
 0x3f5   :  { %v509_v37 = vpop.f32.mrb[12].mxu0 }
 0x3f6   :  { %v516_v39 = vmul.f32 %v2046_v36, %v509_v37  ;;  %v1855_v40 = vpop.f32.mrb[13].mxu0  ;;  %v1000_v37 = vsel %vm142_vm0, %v2422_v28, 0 }
 0x3f7   :  { %v512_v41 = vpop.f32.mrb[14].mxu0  ;;  %v2029_v40 = vld [vmem:[#allocation8 + $0x30] sm:$0xff]  }
 0x3f8   :  { %v517_v43 = vpack.c.bf16 %v516_v39, %v516_v39  ;;  %v1856_v44 = vpop.f32.mrb[15].mxu0 }
 0x3fa   :  { %1862 = vmatmul.mubr.msk.bf16.vlgmr.msra.gmra.mrb[12].mxu1 %vm142_vm0, %v517_v43 }
 0x3fb   :  { %1874 = vmatpush3.bf16.xpose.msra.mxu1 %v640_v45  ;;  %1875 = vmatprep.mubr.msk.bf16.mxu1 %vm2201_vm1, %v2200_v13 }
 0x3fc   :  { %1885 = vmatprep.subr.bf16.mxu1 %v2200_v13 }
 0x402   :  { %1876 = vmatmul.mubr.msk.bf16.vlgmr.msra.gmra.mrb[16].mxu1 %vm142_vm0, %v633_v46 }
 0x403   :  { %1889 = vmatprep.mubr.msk.bf16.mxu1 %vm2201_vm1, %v2200_v13  ;;  %1886 = vmatpush3.bf16.msra.mxu1 %v2027_v9 }
 0x404   :  { %1887 = vmatprep.subr.bf16.mxu1 %v2200_v13 }
 0x407   :  { %1888 = vmatpush3.bf16.msra.mxu1 %v2028_v11 }
 0x408   :  { %1899 = vmatprep.subr.bf16.mxu1 %v2200_v13 }
 0x45a   :  { %v626_v47 = vpop.f32.mrb[16].mxu0 }
 0x45b   :  { %v1871_v48 = vpop.f32.mrb[17].mxu0 }
 0x45c   :  { %v629_v49 = vpop.f32.mrb[18].mxu0  ;;  %v2030_v48 = vld [vmem:[#allocation8 + $0x38] sm:$0xff]  }
 0x45d   :  { %v1872_v51 = vpop.f32.mrb[19].mxu0 }
 0x4cd   :  { %v571_v52 = vpop.f32.mrb[12].mxu1 }
 0x4ce   :  { %v2386_v53 = vadd.f32 %v626_v47, %v571_v52  ;;  %v1863_v54 = vpop.f32.mrb[13].mxu1 }
 0x4cf   :  { %v574_v55 = vpop.f32.mrb[14].mxu1  ;;  %v2449_v54 = vpack.c.bf16 %v2345_v57, %v2345_v57 }
 0x4d0   :  { %v1864_v56 = vpop.f32.mrb[15].mxu1 }
 0x4d5   :  { %v676_v58 = vpop.f32.mrb[16].mxu1 }
 0x4d6   :  { %v682_v59 = vmul.f32 0.17677669, %v676_v58  ;;  %v1877_v60 = vpop.f32.mrb[17].mxu1 }
 0x4d7   :  { %v679_v61 = vpop.f32.mrb[18].mxu1  ;;  %v1058_v60 = vsel %vm351_vm4, %v2449_v54, 0 }
 0x4d8   :  { %v1878_v62 = vpop.f32.mrb[19].mxu1  ;;  %v683_v63 = vsel %vm2338_vm2, %v682_v59, -1e+30 }
 0x4d9   :  { %v684_v0 = vsel %vm337_vm3, %v683_v63, -inf }
 0x4da   :  { %685 = vmax.xlane.f32.xlu1 %v684_v0 }
 0x4eb   :  { %807 = vrot.lane.b32.xlu1 %v2308_v33, %s2203_s20  ;;  %v806_v33 = vpop.permute.xlu0 %805 }
 0x567   :  { %v686_v1 = vpop.xlane.xlu1 %685 }
 0x568   :  { %v687_v2 = vsub.f32 %v683_v63, %v686_v1 }
 0x56a   :  { %v688_v3 = vmul.f32 1.442695, %v687_v2 }
 0x56b   :  { %v808_v5 = vpop.permute.xlu1 %807 }
 0x56c   :  { %2047 = vpow2.f32 %v688_v3  ;;  %v813_v8 = vsel %vm142_vm0, %v808_v5, 0 }
 0x576   :  { %v2048_v4 = vpop.eup %2047 }
 0x577   :  { %v690_v6 = vsel %vm337_vm3, %v2048_v4, 0.0  ;;  %v693_v7 = vpack.c.bf16 %v2048_v4, %v2048_v4 }
 0x578   :  { %691 = vadd.xlane.f32.xlu0 %v690_v6 }
 0x579   :  { %1882 = vmatmul.mubr.msk.bf16.vlgmr.msra.gmra.mrb[20].mxu0 %vm337_vm3, %v693_v7 }
 0x57a   :  { %1894 = vmatpush3.bf16.xpose.msra.mxu0 %v813_v8  ;;  %1895 = vmatprep.mubr.msk.bf16.mxu0 %vm2201_vm1, %v2200_v13 }
 0x57b   :  { %1905 = vmatprep.subr.bf16.mxu0 %v2200_v13 }
 0x581   :  { %1896 = vmatmul.mubr.msk.bf16.vlgmr.msra.gmra.mrb[24].mxu0 %vm142_vm0, %v806_v33 }
 0x582   :  { %1909 = vmatprep.mubr.msk.bf16.mxu0 %vm2201_vm1, %v2200_v13  ;;  %1906 = vmatpush3.bf16.msra.mxu0 %v2029_v40 }
 0x583   :  { %1907 = vmatprep.subr.bf16.mxu0 %v2200_v13 }
 0x586   :  { %1908 = vmatpush3.bf16.msra.mxu0 %v2030_v48 }
 0x587   :  { %1919 = vmatprep.subr.bf16.mxu0 %v2200_v13 }
 0x58e   :  { %867 = vrot.lane.b32.xlu0 %v2323_v42, %s2203_s20 }
 0x592   :  { %1108 = vrot.lane.b32.xlu0 %v2406_v10, %s2202_s3 }
 0x605   :  { %v692_v12 = vpop.xlane.xlu0 %691 }
 0x606   :  { %2049 = vrcp.f32 %v692_v12 }
 0x609   :  { %v868_v17 = vpop.permute.xlu0 %867 }
 0x60a   :  { %v873_v20 = vsel %vm351_vm4, %v868_v17, 0 }
 0x60d   :  { %v1109_v41 = vpop.permute.xlu0 %1108 }
 0x610   :  { %v2050_v14 = vpop.eup %2049 }
 0x64c   :  { %v736_v15 = vpop.f32.mrb[20].mxu0 }
 0x64d   :  { %v743_v16 = vmul.f32 %v2050_v14, %v736_v15  ;;  %v1883_v42 = vpop.f32.mrb[21].mxu0 }
 0x64e   :  { %v739_v18 = vpop.f32.mrb[22].mxu0 }
 0x64f   :  { %v744_v19 = vpack.c.bf16 %v743_v16, %v743_v16  ;;  %v1884_v38 = vpop.f32.mrb[23].mxu0 }
 0x651   :  { %1890 = vmatmul.mubr.msk.bf16.vlgmr.msra.gmra.mrb[20].mxu1 %vm142_vm0, %v744_v19 }
 0x652   :  { %1900 = vmatpush3.bf16.msra.mxu1 %v873_v20  ;;  %1901 = vmatprep.mubr.msk.bf16.mxu1 %vm2201_vm1, %v2200_v13 }
 0x653   :  { %1913 = vmatprep.subr.bf16.mxu1 %v2200_v13 }
 0x654   :  { %v849_v21 = vpop.f32.mrb[24].mxu0 }
 0x655   :  { %v855_v22 = vmul.f32 0.17677669, %v849_v21  ;;  %v1897_v23 = vpop.f32.mrb[25].mxu0 }
 0x656   :  { %v852_v24 = vpop.f32.mrb[26].mxu0  ;;  %v2031_v23 = vld [vmem:[#allocation8] sm:$0xff]  }
 0x657   :  { %v1898_v25 = vpop.f32.mrb[27].mxu0  ;;  %v856_v26 = vsel %vm2338_vm2, %v855_v22, -1e+30 }
 0x658   :  { %v857_v27 = vsel %vm337_vm3, %v856_v26, -inf  ;;  %v2487_v25 = vld [vmem:[%s2559_s4] ss:$0 sm:$0xff]  ;;  %s2204_s4 = smov [#allocation10]  }
 0x659   :  { %858 = vmax.xlane.f32.xlu1 %v857_v27  ;;  %s1697_s23 = sshll.u32 %s2204_s4, 4  ;;  %s1698_s23 = int_to_ptr.vmem [resolvable:$true] %s1697_s23 }
 0x65a   :  { %s2159_s24 = scalar_lea.vmem %s1698_s23, 256  ;;  %p2164_p5 = scmp.lt.s32.totalorder %s1698_s23, %s1698_s23 }
 0x65b   :  { %p2160_p4 = scmp.ne.s32.totalorder %s1698_s23, %s2159_s24  ;;  %p2165_p6 = scmp.lt.s32.totalorder %s2159_s24, %s2159_s24 }
 0x65d   :  { %p2166_p7 = por %p2165_p6, %p2164_p5 }
 0x65f   :  { %p2167_p8 = pnand %p2166_p7, %p2160_p4 }
 0x66a   :  { %1111 = vrot.lane.b32.xlu1 %v2422_v28, %s2202_s3 }
 0x6e6   :  { %v859_v29 = vpop.xlane.xlu1 %858 }
 0x6e7   :  { %v860_v30 = vsub.f32 %v856_v26, %v859_v29 }
 0x6e9   :  { %v861_v31 = vmul.f32 1.442695, %v860_v30 }
 0x6ea   :  { %v1112_v34 = vpop.permute.xlu1 %1111 }
 0x6eb   :  { %2051 = vpow2.f32 %v861_v31  ;;  %v1117_v39 = vsel %vm142_vm0, %v1112_v34, 0 }
 0x6f5   :  { %v2052_v32 = vpop.eup %2051 }
 0x6f6   :  { %v863_v35 = vsel %vm337_vm3, %v2052_v32, 0.0  ;;  %v866_v36 = vpack.c.bf16 %v2052_v32, %v2052_v32  ;;  %v2032_v32 = vld [vmem:[#allocation8 + $0x10] sm:$0xff]  }
 0x6f7   :  { %864 = vadd.xlane.f32.xlu0 %v863_v35  ;;  %v2034_v35 = vld [vmem:[#allocation8 + $0x18] sm:$0xff]  }
 0x6f8   :  { %1902 = vmatmul.mubr.msk.bf16.vlgmr.msra.gmra.mrb[24].mxu1 %vm337_vm3, %v866_v36 }
 0x6f9   :  { %1914 = vmatpush3.bf16.xpose.msra.mxu1 %v1000_v37  ;;  %1915 = vmatprep.mubr.msk.bf16.mxu1 %vm2201_vm1, %v2200_v13 }
 0x6fa   :  { %1925 = vmatprep.subr.bf16.mxu1 %v2200_v13 }
 0x700   :  { %1916 = vmatmul.mubr.msk.bf16.vlgmr.msra.gmra.mrb[28].mxu1 %vm142_vm0, %v2406_v10 }
 0x701   :  { %1926 = vmatpush3.bf16.xpose.msra.mxu1 %v1117_v39  ;;  %1927 = vmatprep.mubr.msk.bf16.mxu1 %vm2201_vm1, %v2200_v13 }
 0x702   :  { %1937 = vmatprep.subr.bf16.mxu1 %v2200_v13 }
 0x708   :  { %1928 = vmatmul.mubr.msk.bf16.vlgmr.msra.gmra.mrb[32].mxu1 %vm142_vm0, %v1109_v41 }
 0x709   :  { %1941 = vmatprep.mubr.msk.bf16.mxu1 %vm2201_vm1, %v2200_v13  ;;  %1938 = vmatpush3.bf16.msra.mxu1 %v2032_v32 }
 0x70a   :  { %1939 = vmatprep.subr.bf16.mxu1 %v2200_v13 }
 0x70d   :  { %1940 = vmatpush3.bf16.msra.mxu1 %v2034_v35 }
 0x70e   :  { %1953 = vmatprep.subr.bf16.mxu1 %v2200_v13 }
 0x724   :  { %v798_v43 = vpop.f32.mrb[20].mxu1 }
 0x725   :  { %v2444_v44 = vadd.f32 %v798_v43, %v2386_v53  ;;  %v1891_v45 = vpop.f32.mrb[21].mxu1 }
 0x726   :  { %v801_v46 = vpop.f32.mrb[22].mxu1 }
 0x727   :  { %v1892_v47 = vpop.f32.mrb[23].mxu1 }
 0x784   :  { %v865_v49 = vpop.xlane.xlu0 %864 }
 0x785   :  { %2053 = vrcp.f32 %v865_v49 }
 0x78f   :  { %v2054_v51 = vpop.eup %2053 }
 0x7cb   :  { %v909_v52 = vpop.f32.mrb[24].mxu1 }
 0x7cc   :  { %v916_v55 = vmul.f32 %v2054_v51, %v909_v52  ;;  %v1903_v56 = vpop.f32.mrb[25].mxu1 }
 0x7cd   :  { %v912_v58 = vpop.f32.mrb[26].mxu1 }
 0x7ce   :  { %v917_v53 = vpack.c.bf16 %v916_v55, %v916_v55  ;;  %v1904_v59 = vpop.f32.mrb[27].mxu1 }
 0x7d0   :  { %1910 = vmatmul.mubr.msk.bf16.vlgmr.msra.gmra.mrb[28].mxu0 %vm142_vm0, %v917_v53 }
 0x7d1   :  { %1920 = vmatpush3.bf16.msra.mxu0 %v1058_v60  ;;  %1921 = vmatprep.mubr.msk.bf16.mxu0 %vm2201_vm1, %v2200_v13 }
 0x7d2   :  { %1931 = vmatprep.subr.bf16.mxu0 %v2200_v13 }
 0x7d3   :  { %v1036_v61 = vpop.f32.mrb[28].mxu1 }
 0x7d4   :  { %v1042_v62 = vmul.f32 0.17677669, %v1036_v61  ;;  %v1917_v57 = vpop.f32.mrb[29].mxu1 }
 0x7d5   :  { %v1039_v63 = vpop.f32.mrb[30].mxu1 }
 0x7d6   :  { %v1918_v0 = vpop.f32.mrb[31].mxu1  ;;  %v1043_v1 = vsel %vm2338_vm2, %v1042_v62, -1e+30 }
 0x7d7   :  { %v1044_v2 = vsel %vm337_vm3, %v1043_v1, -inf }
 0x7d8   :  { %1045 = vmax.xlane.f32.xlu1 %v1044_v2 }
 0x7db   :  { %v1153_v3 = vpop.f32.mrb[32].mxu1 }
 0x7dc   :  { %v1159_v4 = vmul.f32 0.17677669, %v1153_v3  ;;  %v1929_v5 = vpop.f32.mrb[33].mxu1 }
 0x7dd   :  { %v1156_v6 = vpop.f32.mrb[34].mxu1 }
 0x7de   :  { %v1930_v7 = vpop.f32.mrb[35].mxu1  ;;  %v1160_v8 = vsel %vm2338_vm2, %v1159_v4, -1e+30 }
 0x7df   :  { %v1161_v33 = vsel %vm337_vm3, %v1160_v8, -inf }
 0x7e0   :  { %1162 = vmax.xlane.f32.xlu0 %v1161_v33 }
 0x7f6   :  { %1172 = vrot.lane.b32.xlu0 %v2449_v54, %s2202_s3 }
 0x7fa   :  { %1337 = vrot.lane.b32.xlu0 %v2406_v10, %s2197_s2 }
 0x865   :  { %v1046_v9 = vpop.xlane.xlu1 %1045 }
 0x866   :  { %v1047_v11 = vsub.f32 %v1043_v1, %v1046_v9 }
 0x868   :  { %v1048_v12 = vmul.f32 1.442695, %v1047_v11 }
 0x86a   :  { %2055 = vpow2.f32 %v1048_v12 }
 0x86d   :  { %v1163_v14 = vpop.xlane.xlu0 %1162 }
 0x86e   :  { %v1164_v15 = vsub.f32 %v1160_v8, %v1163_v14 }
 0x870   :  { %v1165_v16 = vmul.f32 1.442695, %v1164_v15 }
 0x871   :  { %v1173_v17 = vpop.permute.xlu0 %1172 }
 0x872   :  { %2057 = vpow2.f32 %v1165_v16  ;;  %v1178_v38 = vsel %vm351_vm4, %v1173_v17, 0 }
 0x874   :  { %v2056_v42 = vpop.eup %2055 }
 0x875   :  { %v1050_v18 = vsel %vm337_vm3, %v2056_v42, 0.0  ;;  %v1053_v19 = vpack.c.bf16 %v2056_v42, %v2056_v42  ;;  %v1338_v36 = vpop.permute.xlu0 %1337 }
 0x876   :  { %1051 = vadd.xlane.f32.xlu0 %v1050_v18 }
 0x877   :  { %1922 = vmatmul.mubr.msk.bf16.vlgmr.msra.gmra.mrb[32].mxu0 %vm337_vm3, %v1053_v19 }
 0x878   :  { %1932 = vmatpush3.bf16.msra.mxu0 %v1178_v38  ;;  %1933 = vmatprep.mubr.msk.bf16.mxu0 %vm2201_vm1, %v2200_v13  ;;  %v2035_v38 = vld [vmem:[#allocation8 + $0x20] sm:$0xff]  }
 0x879   :  { %1945 = vmatprep.subr.bf16.mxu0 %v2200_v13 }
 0x87c   :  { %v2058_v20 = vpop.eup %2057 }
 0x87d   :  { %v1167_v21 = vsel %vm337_vm3, %v2058_v20, 0.0  ;;  %v1170_v22 = vpack.c.bf16 %v2058_v20, %v2058_v20  ;;  %v2036_v20 = vld [vmem:[#allocation8 + $0x28] sm:$0xff]  }
 0x87e   :  { %1168 = vadd.xlane.f32.xlu1 %v1167_v21 }
 0x87f   :  { %1934 = vmatmul.mubr.msk.bf16.vlgmr.msra.gmra.mrb[36].mxu0 %vm337_vm3, %v1170_v22 }
 0x880   :  { %1949 = vmatprep.mubr.msk.bf16.mxu0 %vm2201_vm1, %v2200_v13  ;;  %1946 = vmatpush3.bf16.msra.mxu0 %v2031_v23 }
 0x881   :  { %1947 = vmatprep.subr.bf16.mxu0 %v2200_v13 }
 0x88c   :  { %1399 = vrot.lane.b32.xlu0 %v2449_v54, %s2197_s2 }
 0x88f   :  { %1339 = vrot.lane.b32.xlu1 %v2422_v28, %s2197_s2 }
 0x890   :  { %1510 = vrot.lane.b32.xlu0 %v2406_v10, %s2203_s20  ;;  %v2033_v10 = vld [vmem:[#allocation8 + $0x8] sm:$0xff]  }
 0x891   :  { %1948 = vmatpush3.bf16.msra.mxu0 %v2033_v10 }
 0x892   :  { %1959 = vmatprep.subr.bf16.mxu0 %v2200_v13 }
 0x8a3   :  { %v971_v24 = vpop.f32.mrb[28].mxu0 }
 0x8a4   :  { %v977_v26 = vadd.f32 %v971_v24, %v2444_v44  ;;  %v1911_v27 = vpop.f32.mrb[29].mxu0 }
 0x8a5   :  { %v974_v29 = vpop.f32.mrb[30].mxu0 }
 0x8a6   :  { %v985_v30 = vadd.f32 %v2487_v25, %v977_v26  ;;  %v1912_v31 = vpop.f32.mrb[31].mxu0 }
 0x8a8   :  { %986 = vst [vmem:[#allocation10] sm:$0xff] %v985_v30 }
 0x903   :  { %v1052_v37 = vpop.xlane.xlu0 %1051 }
 0x904   :  { %2059 = vrcp.f32 %v1052_v37 }
 0x907   :  { %v1400_v44 = vpop.permute.xlu0 %1399 }
 0x908   :  { %v1405_v48 = vsel %vm351_vm4, %v1400_v44, 0 }
 0x90b   :  { %v1169_v34 = vpop.xlane.xlu1 %1168 }
 0x90c   :  { %2061 = vrcp.f32 %v1169_v34 }
 0x90e   :  { %v2060_v39 = vpop.eup %2059 }
 0x90f   :  { %v1340_v56 = vpop.permute.xlu1 %1339 }
 0x910   :  { %v1345_v60 = vsel %vm142_vm0, %v1340_v56, 0 }
 0x916   :  { %v2062_v49 = vpop.eup %2061 }
 0x94a   :  { %v1094_v40 = vpop.f32.mrb[32].mxu0 }
 0x94b   :  { %v1101_v41 = vmul.f32 %v2060_v39, %v1094_v40  ;;  %v1923_v43 = vpop.f32.mrb[33].mxu0 }
 0x94c   :  { %v1097_v45 = vpop.f32.mrb[34].mxu0 }
 0x94d   :  { %v1102_v46 = vpack.c.bf16 %v1101_v41, %v1101_v41  ;;  %v1924_v47 = vpop.f32.mrb[35].mxu0 }
 0x94f   :  { %1950 = vmatmul.mubr.msk.bf16.vlgmr.msra.gmra.mrb[40].mxu0 %vm142_vm0, %v1102_v46 }
 0x950   :  { %1960 = vmatpush3.bf16.msra.mxu0 %v1405_v48  ;;  %1961 = vmatprep.mubr.msk.bf16.mxu0 %vm2201_vm1, %v2200_v13 }
 0x951   :  { %1973 = vmatprep.subr.bf16.mxu0 %v2200_v13 }
 0x952   :  { %v1214_v51 = vpop.f32.mrb[36].mxu0 }
 0x953   :  { %v1221_v52 = vmul.f32 %v2062_v49, %v1214_v51  ;;  %v1935_v55 = vpop.f32.mrb[37].mxu0 }
 0x954   :  { %v1217_v58 = vpop.f32.mrb[38].mxu0  ;;  %v2038_v55 = vld [vmem:[#allocation8 + $0x38] sm:$0xff]  }
 0x955   :  { %v1222_v53 = vpack.c.bf16 %v1221_v52, %v1221_v52  ;;  %v1936_v59 = vpop.f32.mrb[39].mxu0 }
 0x957   :  { %1942 = vmatmul.mubr.msk.bf16.vlgmr.msra.gmra.mrb[36].mxu1 %vm142_vm0, %v1222_v53 }
 0x958   :  { %1954 = vmatpush3.bf16.xpose.msra.mxu1 %v1345_v60  ;;  %1955 = vmatprep.mubr.msk.bf16.mxu1 %vm2201_vm1, %v2200_v13 }
 0x959   :  { %1965 = vmatprep.subr.bf16.mxu1 %v2200_v13 }
 0x95f   :  { %1956 = vmatmul.mubr.msk.bf16.vlgmr.msra.gmra.mrb[40].mxu1 %vm142_vm0, %v1338_v36 }
 0x960   :  { %1969 = vmatprep.mubr.msk.bf16.mxu1 %vm2201_vm1, %v2200_v13  ;;  %1966 = vmatpush3.bf16.msra.mxu1 %v2035_v38 }
 0x961   :  { %1967 = vmatprep.subr.bf16.mxu1 %v2200_v13 }
 0x964   :  { %1968 = vmatpush3.bf16.msra.mxu1 %v2036_v20 }
 0x965   :  { %1979 = vmatprep.subr.bf16.mxu1 %v2200_v13 }
 0xa22   :  { %v1331_v61 = vpop.f32.mrb[40].mxu0 }
 0xa23   :  { %v1951_v62 = vpop.f32.mrb[41].mxu0 }
 0xa24   :  { %v1334_v57 = vpop.f32.mrb[42].mxu0 }
 0xa25   :  { %v1952_v63 = vpop.f32.mrb[43].mxu0 }
 0xa2a   :  { %v1276_v0 = vpop.f32.mrb[36].mxu1 }
 0xa2b   :  { %v2507_v1 = vadd.f32 %v1331_v61, %v1276_v0  ;;  %v1943_v2 = vpop.f32.mrb[37].mxu1 }
 0xa2c   :  { %v1279_v3 = vpop.f32.mrb[38].mxu1 }
 0xa2d   :  { %v1944_v4 = vpop.f32.mrb[39].mxu1 }
 0xa32   :  { %v1381_v5 = vpop.f32.mrb[40].mxu1 }
 0xa33   :  { %v1387_v6 = vmul.f32 0.17677669, %v1381_v5  ;;  %v1957_v7 = vpop.f32.mrb[41].mxu1 }
 0xa34   :  { %v1384_v8 = vpop.f32.mrb[42].mxu1 }
 0xa35   :  { %v1958_v33 = vpop.f32.mrb[43].mxu1  ;;  %v1388_v9 = vsel %vm2338_vm2, %v1387_v6, -1e+30 }
 0xa36   :  { %v1389_v11 = vsel %vm337_vm3, %v1388_v9, -inf }
 0xa37   :  { %1390 = vmax.xlane.f32.xlu1 %v1389_v11 }
 0xa48   :  { %1512 = vrot.lane.b32.xlu1 %v2422_v28, %s2203_s20  ;;  %v1511_v28 = vpop.permute.xlu0 %1510 }
 0xac4   :  { %v1391_v12 = vpop.xlane.xlu1 %1390 }
 0xac5   :  { %v1392_v14 = vsub.f32 %v1388_v9, %v1391_v12 }
 0xac7   :  { %v1393_v15 = vmul.f32 1.442695, %v1392_v14 }
 0xac8   :  { %v1513_v42 = vpop.permute.xlu1 %1512 }
 0xac9   :  { %2063 = vpow2.f32 %v1393_v15  ;;  %v1518_v19 = vsel %vm142_vm0, %v1513_v42, 0 }
 0xad3   :  { %v2064_v16 = vpop.eup %2063 }
 0xad4   :  { %v1395_v17 = vsel %vm337_vm3, %v2064_v16, 0.0  ;;  %v1398_v18 = vpack.c.bf16 %v2064_v16, %v2064_v16 }
 0xad5   :  { %1396 = vadd.xlane.f32.xlu1 %v1395_v17 }
 0xad6   :  { %1962 = vmatmul.mubr.msk.bf16.vlgmr.msra.gmra.mrb[44].mxu0 %vm337_vm3, %v1398_v18 }
 0xad7   :  { %1974 = vmatpush3.bf16.xpose.msra.mxu0 %v1518_v19  ;;  %1975 = vmatprep.mubr.msk.bf16.mxu0 %vm2201_vm1, %v2200_v13 }
 0xad8   :  { %1985 = vmatprep.subr.bf16.mxu0 %v2200_v13 }
 0xade   :  { %1976 = vmatmul.mubr.msk.bf16.vlgmr.msra.gmra.mrb[48].mxu0 %vm142_vm0, %v1511_v28 }
 0xadf   :  { %1989 = vmatprep.mubr.msk.bf16.mxu0 %vm2201_vm1, %v2200_v13  ;;  %1986 = vmatpush3.bf16.msra.mxu0 %v2037_v50 }
 0xae0   :  { %1987 = vmatprep.subr.bf16.mxu0 %v2200_v13 }
 0xae3   :  { %1988 = vmatpush3.bf16.msra.mxu0 %v2038_v55 }
 0xb62   :  { %v1397_v21 = vpop.xlane.xlu1 %1396 }
 0xb63   :  { %2065 = vrcp.f32 %v1397_v21 }
 0xb6d   :  { %v2066_v22 = vpop.eup %2065 }
 0xba9   :  { %v1441_v23 = vpop.f32.mrb[44].mxu0 }
 0xbaa   :  { %v1448_v24 = vmul.f32 %v2066_v22, %v1441_v23  ;;  %v1963_v26 = vpop.f32.mrb[45].mxu0 }
 0xbab   :  { %v1444_v27 = vpop.f32.mrb[46].mxu0 }
 0xbac   :  { %v1449_v29 = vpack.c.bf16 %v1448_v24, %v1448_v24  ;;  %v1964_v30 = vpop.f32.mrb[47].mxu0 }
 0xbae   :  { %1970 = vmatmul.mubr.msk.bf16.vlgmr.msra.gmra.mrb[44].mxu1 %vm142_vm0, %v1449_v29 }
 0xbaf   :  { %1981 = vmatprep.mubr.msk.bf16.mxu1 %vm2201_vm1, %v2200_v13 }
 0xbb1   :  { %v1554_v31 = vpop.f32.mrb[48].mxu0 }
 0xbb2   :  { %v1560_v32 = vmul.f32 0.17677669, %v1554_v31  ;;  %v1977_v10 = vpop.f32.mrb[49].mxu0 }
 0xbb3   :  { %v1557_v35 = vpop.f32.mrb[50].mxu0 }
 0xbb4   :  { %v1978_v36 = vpop.f32.mrb[51].mxu0  ;;  %v1561_v37 = vsel %vm2338_vm2, %v1560_v32, -1e+30 }
 0xbb5   :  { %v1562_v34 = vsel %vm337_vm3, %v1561_v37, -inf }
 0xbb6   :  { %1563 = vmax.xlane.f32.xlu0 %v1562_v34 }
 0xbcc   :  { %1572 = vrot.lane.b32.xlu0 %v2449_v54, %s2203_s20 }
 0xc43   :  { %v1564_v39 = vpop.xlane.xlu0 %1563 }
 0xc44   :  { %v1565_v40 = vsub.f32 %v1561_v37, %v1564_v39 }
 0xc46   :  { %v1566_v41 = vmul.f32 1.442695, %v1565_v40 }
 0xc47   :  { %v1573_v43 = vpop.permute.xlu0 %1572 }
 0xc48   :  { %2067 = vpow2.f32 %v1566_v41  ;;  %v1578_v44 = vsel %vm351_vm4, %v1573_v43, 0 }
 0xc49   :  { %1980 = vmatpush3.bf16.msra.mxu1 %v1578_v44 }
 0xc52   :  { %v2068_v45 = vpop.eup %2067 }
 0xc53   :  { %v1568_v46 = vsel %vm337_vm3, %v2068_v45, 0.0  ;;  %v1571_v47 = vpack.c.bf16 %v2068_v45, %v2068_v45 }
 0xc54   :  { %1569 = vadd.xlane.f32.xlu1 %v1568_v46 }
 0xc55   :  { %1982 = vmatmul.mubr.msk.bf16.vlgmr.msra.gmra.mrb[48].mxu1 %vm337_vm3, %v1571_v47 }
 0xc81   :  { %v1503_v54 = vpop.f32.mrb[44].mxu1 }
 0xc82   :  { %v1509_v48 = vadd.f32 %v1503_v54, %v2507_v1  ;;  %v1971_v49 = vpop.f32.mrb[45].mxu1 }
 0xc83   :  { %v1506_v51 = vpop.f32.mrb[46].mxu1 }
 0xc84   :  { %v1972_v52 = vpop.f32.mrb[47].mxu1 }
 0xce1   :  { %v1570_v56 = vpop.xlane.xlu1 %1569 }
 0xce2   :  { %2069 = vrcp.f32 %v1570_v56 }
 0xcec   :  { %v2070_v58 = vpop.eup %2069 }
 0xd28   :  { %v1614_v53 = vpop.f32.mrb[48].mxu1 }
 0xd29   :  { %v1621_v59 = vmul.f32 %v2070_v58, %v1614_v53  ;;  %v1983_v60 = vpop.f32.mrb[49].mxu1 }
 0xd2a   :  { %v1617_v61 = vpop.f32.mrb[50].mxu1 }
 0xd2b   :  { %v1622_v62 = vpack.c.bf16 %v1621_v59, %v1621_v59  ;;  %v1984_v57 = vpop.f32.mrb[51].mxu1 }
 0xd2d   :  { %1990 = vmatmul.mubr.msk.bf16.vlgmr.msra.gmra.mrb[52].mxu0 %vm142_vm0, %v1622_v62 }
 0xe00   :  { %v1676_v13 = vpop.f32.mrb[52].mxu0 }
 0xe01   :  { %v1682_v63 = vadd.f32 %v1676_v13, %v1509_v48  ;;  %v1991_v0 = vpop.f32.mrb[53].mxu0 }
 0xe02   :  { %v1679_v1 = vpop.f32.mrb[54].mxu0 }
 0xe03   :  { %v1690_v2 = vadd.f32 %v2487_v25, %v1682_v63  ;;  %v1992_v3 = vpop.f32.mrb[55].mxu0 }
 0xe05   :  { %1691 = vst [vmem:[#allocation10 + $0x8] sm:$0xff] %v1690_v2 }
 0xe06   :  { %2170 = shalt.err (!%p2167_p8)
}
 0xe07   :  { %s2171_s27 = scalar_lea.hbm %s2560_s5, 256 }
 0xe08   :  { %p2172_p9 = scmp.ne.s32.totalorder %s2560_s5, %s2171_s27  ;;  %p2175_p10 = scmp.lt.u32.totalorder %s2171_s27, %s2560_s5 }
 0xe0a   :  { %p2177_p11 = pnand %p2175_p10, %p2172_p9 }
 0xe0c   :  { %2180 = shalt.err (!%p2177_p11)
}
 0xe0d   :  { %1703 = dma.vmem_to_hbm [thread:$0]  %s1698_s23, 256, %s2560_s5, [#allocation4], %s2193_s1, %s2193_s1, %s2194_s17  }
 0xe0e   :  { %2187 = dma.done.wait [#allocation4], 256  }
 0xe0f   :  { %2188 = vsyncadd [#allocation4], 4294967040 }
 0xe10   :  { %1707 = vsyncpa [#allocation3], 1 }
 0xe11   :  { %1708 = vsyncpa [#allocation6], 1 }
 0xe12   :  { %1709 = vsyncpa [#allocation9], 1 }
 0xe13   :  { %1710 = vsyncpa [#allocation4], 1 }

</bundles_post_ra>
